<compile_context>
chip_gen: v6e
topology: v6e:2x2x1
jax: 0.10.0
libtpu: 0.0.40
codegen_flags: <defaults>
</compile_context>

<pallas_src>
import functools

import jax
import jax.numpy as jnp
from jax.experimental import pallas as pl
from jax.experimental.pallas import tpu as pltpu

HIDDEN = 256          # hidden_size (module default)
MAX_TOKEN = 6
PART = MAX_TOKEN - 2  # number of parts
D1, D2, D3 = 128, 32, 3
LN_EPS = 1e-5         # torch.nn.LayerNorm default
TM_DEFAULT = 512      # rows per grid step (multiple of 128 and 256)


def _round_up(x, m):
    return ((x + m - 1) // m) * m


def _layernorm_no_affine(h, eps=LN_EPS):
    """Two-pass LayerNorm (reference path only)."""
    mu = jnp.mean(h, axis=-1, keepdims=True)
    d = h - mu
    var = jnp.mean(d * d, axis=-1, keepdims=True)
    return d * jax.lax.rsqrt(var + eps)


def final_block_kernel(x_ref, w1_ref, b1_ref, w2t_ref, b2t_ref, w3t_ref,
                       b3t_ref, o_ref):
    """Fused final_block for one (TM, H) tile of tokens.

    Matmuls accumulate in f32; LayerNorm math is f32.  Rows of the ragged
    last tile beyond n_tok contain unspecified VMEM data: every op here is
    row/column independent and Pallas drops out-of-range output columns, so
    this is safe — but do NOT add cross-row reductions over TM.
    """
    # ---- Stage 1: Linear(H -> 128), operands at native dtype (bf16 MXU). ----
    h = jnp.dot(x_ref[...], w1_ref[...], preferred_element_type=jnp.float32)
    h = h + b1_ref[...]                                       # (TM, D1) f32
    # One-pass LayerNorm over the last axis + fused ReLU.
    mu = jnp.mean(h, axis=-1, keepdims=True)
    ms = jnp.mean(h * h, axis=-1, keepdims=True)
    var = jnp.maximum(ms - mu * mu, 0.0)
    h = jnp.maximum((h - mu) * jax.lax.rsqrt(var + LN_EPS), 0.0)

    # ---- Stage 2 (transposed, lane-dense): h2^T = w2^T @ h^T -> (D2, TM). ---
    h2t = jax.lax.dot_general(
        w2t_ref[...], h.astype(w2t_ref.dtype),
        dimension_numbers=(((1,), (1,)), ((), ())),
        preferred_element_type=jnp.float32)
    h2t = h2t + b2t_ref[...]                                  # (D2, 1) bcast
    mu2 = jnp.mean(h2t, axis=0, keepdims=True)
    ms2 = jnp.mean(h2t * h2t, axis=0, keepdims=True)
    var2 = jnp.maximum(ms2 - mu2 * mu2, 0.0)
    h2t = jnp.maximum((h2t - mu2) * jax.lax.rsqrt(var2 + LN_EPS), 0.0)

    # ---- Stage 3: y^T = w3^T @ h2^T -> (3, TM); lane-dense store. -----------
    y_t = jnp.dot(w3t_ref[...], h2t, preferred_element_type=jnp.float32)
    o_ref[...] = (y_t + b3t_ref[...]).astype(o_ref.dtype)


@functools.partial(jax.jit, static_argnames=("tm", "compute_dtype"))
def final_block_pallas(feats, w1, b1, w2, b2, w3, b3, *,
                       tm=TM_DEFAULT, compute_dtype=jnp.bfloat16):
    """feats: (B, P, H) -> (B, P, 3). Fused Linear/LN/ReLU x2 + Linear."""
    B, P, H = feats.shape
    n_tok = B * P
    # Activations fed at compute_dtype (bf16 default): XLA fuses this cast
    # into the producer, so the HBM slab is written + read at half width.
    x2d = feats.reshape(n_tok, H).astype(compute_dtype)

    # Pre-cast / pre-transpose weights once here (no per-grid-step casts in
    # the kernel).  Biases stay f32 (they add onto f32 accumulators).
    w1c = w1.astype(compute_dtype)                   # (H, D1)
    w2t = w2.T.astype(compute_dtype)                 # (D2, D1)
    w3t = w3.T.astype(jnp.float32)                   # (D3, D2)
    b1r = b1.reshape(1, D1).astype(jnp.float32)
    b2t = b2.reshape(D2, 1).astype(jnp.float32)
    b3t = b3.reshape(D3, 1).astype(jnp.float32)

    # Rows per grid step: multiple of 128, no zero-pad copy (ragged last tile
    # is masked by Pallas).  Keep >= 2 grid steps when there is enough work so
    # both v7x TensorCores receive steps.
    tm = max(128, min(tm, _round_up(n_tok, 128)))
    if n_tok >= 256 and pl.cdiv(n_tok, tm) < 2:
        tm = _round_up(pl.cdiv(n_tok, 2), 128)
    grid = pl.cdiv(n_tok, tm)

    out_t = pl.pallas_call(
        final_block_kernel,
        out_shape=jax.ShapeDtypeStruct((D3, n_tok), jnp.float32),
        grid_spec=pltpu.PrefetchScalarGridSpec(
            num_scalar_prefetch=0,
            grid=(grid,),
            in_specs=[
                pl.BlockSpec((tm, H), lambda i: (i, 0)),    # x tile
                pl.BlockSpec((H, D1), lambda i: (0, 0)),    # w1
                pl.BlockSpec((1, D1), lambda i: (0, 0)),    # b1 (row)
                pl.BlockSpec((D2, D1), lambda i: (0, 0)),   # w2^T
                pl.BlockSpec((D2, 1), lambda i: (0, 0)),    # b2 (column)
                pl.BlockSpec((D3, D2), lambda i: (0, 0)),   # w3^T
                pl.BlockSpec((D3, 1), lambda i: (0, 0)),    # b3 (column)
            ],
            out_specs=pl.BlockSpec((D3, tm), lambda i: (0, i)),
        ),
        compiler_params=pltpu.CompilerParams(
            dimension_semantics=("parallel",)),
    )(x2d, w1c, b1r, w2t, b2t, w3t, b3t)

    return out_t.T.reshape(B, P, D3)


def final_block_reference(x, w1, b1, w2, b2, w3, b3):
    """Pure-JAX reference of nn.Sequential final_block (f32 math)."""
    h = x.astype(jnp.float32) @ w1.astype(jnp.float32) + b1
    h = jnp.maximum(_layernorm_no_affine(h), 0.0)
    h = h @ w2.astype(jnp.float32) + b2
    h = jnp.maximum(_layernorm_no_affine(h), 0.0)
    return h @ w3.astype(jnp.float32) + b3


def point_decoder_simple_forward(params, encoder_output, point_ratio,
                                 encoder_output_full=None, mask=None,
                                 *, point_num=1024, use_pallas=True,
                                 compute_dtype=jnp.bfloat16):
    """Forward of PointDecoderSimple.

    The torch forward's `input_point`, `input_label`, `input_ratio`, `n` args
    are unused (input_point is overwritten before use), so they are omitted.
    Returns (points, labels), like the reference.
    """
    bs, part, _ = encoder_output.shape

    # --- per-part point budget -> labels & within-part positions ------------
    part_points = jnp.ceil(point_ratio * point_num).astype(jnp.int32)   # (bs, part)
    csum = jnp.cumsum(part_points, axis=1)                              # (bs, part)
    starts = csum - part_points
    total = csum[:, -1]
    p = jnp.arange(point_num, dtype=jnp.int32)

    # searchsorted-right: label = #cumsum entries <= p  (matches the torch
    # pointer loop, including the overflow-truncation and the zero-filled tail)
    raw_label = jnp.sum(p[None, :, None] >= csum[:, None, :],
                        axis=-1, dtype=jnp.int32)                       # (bs, point_num)
    in_range = p[None, :] < total[:, None]
    labels = jnp.where(in_range, jnp.minimum(raw_label, part - 1), 0)
    start_at = jnp.take_along_axis(starts, labels, axis=1)
    position = jnp.where(in_range, p[None, :] - start_at, 0)            # (bs, point_num)

    # --- gather part features + positional embedding ------------------------
    part_feat_cat = encoder_output[jnp.arange(bs)[:, None], labels]     # (bs, pn, H)
    position_encodings = params["pos_table"][position]                  # (bs, pn, H)
    input_point = position_encodings + part_feat_cat

    # TODO(synk): self.decoder (LabelWiseCrossTransformerEncoder) is undefined
    # in the reference source; identity pass-through used here.
    decoded = input_point

    if use_pallas:
        points = final_block_pallas(decoded, params["w1"], params["b1"],
                                    params["w2"], params["b2"],
                                    params["w3"], params["b3"],
                                    compute_dtype=compute_dtype)
    else:
        points = final_block_reference(decoded, params["w1"], params["b1"],
                                       params["w2"], params["b2"],
                                       params["w3"], params["b3"])
    return points, labels


def _init_linear(key, fan_in, fan_out):
    # deterministic PyTorch-Linear-style uniform init, stored as (in, out)
    kw, kb = jax.random.split(key)
    bound = 1.0 / (fan_in ** 0.5)
    w = jax.random.uniform(kw, (fan_in, fan_out), jnp.float32, -bound, bound)
    b = jax.random.uniform(kb, (fan_out,), jnp.float32, -bound, bound)
    return w, b


if __name__ == "__main__":
    key = jax.random.PRNGKey(0)
    ks = jax.random.split(key, 8)

    bs = 2
    point_num = 1000            # small test size; exercises the ragged tail
    hidden, part = HIDDEN, PART

    # ---- parameters (self.embed is unused in the reference forward) --------
    pos_table = jax.random.normal(ks[0], (16384, hidden), jnp.float32)
    pos_table = pos_table.at[-1].set(0.0)          # nn.Embedding(padding_idx=-1)
    w1, b1 = _init_linear(ks[1], hidden, D1)
    w2, b2 = _init_linear(ks[2], D1, D2)
    w3, b3 = _init_linear(ks[3], D2, D3)
    params = dict(pos_table=pos_table, w1=w1, b1=b1, w2=w2, b2=b2, w3=w3, b3=b3)

    # ---- inputs -------------------------------------------------------------
    encoder_output = jax.random.normal(ks[4], (bs, part, hidden), jnp.float32)
    encoder_output_full = jax.random.normal(ks[5], (bs, part + 2, hidden),
                                            jnp.float32)
    mask = jnp.ones((bs, 1, part + 2), jnp.bool_)
    r = jax.random.uniform(ks[6], (bs, part), jnp.float32, 0.05, 1.0)
    point_ratio = r / jnp.sum(r, axis=1, keepdims=True)

    # ---- default (bf16-activation) Pallas path vs f32 reference -------------
    fwd = jax.jit(functools.partial(point_decoder_simple_forward,
                                    point_num=point_num, use_pallas=True))
    points, labels = fwd(params, encoder_output, point_ratio,
                         encoder_output_full, mask)
    points = jax.block_until_ready(points)

    ref_points, ref_labels = point_decoder_simple_forward(
        params, encoder_output, point_ratio, encoder_output_full, mask,
        point_num=point_num, use_pallas=False)

    assert points.shape == (bs, point_num, D3), points.shape
    assert labels.shape == (bs, point_num), labels.shape
    assert bool(jnp.all(labels == ref_labels))
    assert bool(jnp.all((labels >= 0) & (labels < part)))
    err_bf = float(jnp.max(jnp.abs(points - ref_points)))
    assert err_bf < 7e-2, f"bf16-path final_block mismatch, max abs err = {err_bf}"

    # ---- exactness check of the fused kernel math at f32 --------------------
    feats_demo = jax.random.normal(ks[7], (2, 384, hidden), jnp.float32)
    out_f32 = final_block_pallas(feats_demo, w1, b1, w2, b2, w3, b3,
                                 compute_dtype=jnp.float32)
    out_f32 = jax.block_until_ready(out_f32)
    ref_f32 = final_block_reference(feats_demo, w1, b1, w2, b2, w3, b3)
    err_f32 = float(jnp.max(jnp.abs(out_f32 - ref_f32)))
    assert err_f32 < 2e-3, f"f32 final_block mismatch, max abs err = {err_f32}"

    print("KERNEL_OK")
</pallas_src>

<mosaic_0001>
module attributes {stable_mosaic.version = 11 : i64} {
  func.func @final_block_kernel(%arg0: i32, %arg1: memref<512x256xbf16, #tpu.memory_space<vmem>>, %arg2: memref<256x128xbf16, #tpu.memory_space<vmem>>, %arg3: memref<1x128xf32, #tpu.memory_space<vmem>>, %arg4: memref<32x128xbf16, #tpu.memory_space<vmem>>, %arg5: memref<32x1xf32, #tpu.memory_space<vmem>>, %arg6: memref<3x32xf32, #tpu.memory_space<vmem>>, %arg7: memref<3x1xf32, #tpu.memory_space<vmem>>, %arg8: memref<3x512xf32, #tpu.memory_space<vmem>>) attributes {dimension_semantics = [#tpu.dimension_semantics<parallel>], iteration_bounds = array<i64: 4>, scalar_prefetch = 0 : i64, scratch_operands = 0 : i64, tpu.core_type = #tpu.core_type<tc>, window_params = [{transform_indices = @transform_0, window_bounds = array<i64: 512, 256>}, {pipeline_mode = #tpu.pipeline_mode<synchronous>, transform_indices = @transform_1, window_bounds = array<i64: 256, 128>}, {pipeline_mode = #tpu.pipeline_mode<synchronous>, transform_indices = @transform_2, window_bounds = array<i64: 1, 128>}, {pipeline_mode = #tpu.pipeline_mode<synchronous>, transform_indices = @transform_3, window_bounds = array<i64: 32, 128>}, {pipeline_mode = #tpu.pipeline_mode<synchronous>, transform_indices = @transform_4, window_bounds = array<i64: 32, 1>}, {pipeline_mode = #tpu.pipeline_mode<synchronous>, transform_indices = @transform_5, window_bounds = array<i64: 3, 32>}, {pipeline_mode = #tpu.pipeline_mode<synchronous>, transform_indices = @transform_6, window_bounds = array<i64: 3, 1>}, {transform_indices = @transform_7, window_bounds = array<i64: 3, 512>}]} {
    %c0 = arith.constant 0 : index
    %c0_0 = arith.constant 0 : index
    %0 = vector.load %arg1[%c0, %c0_0] : memref<512x256xbf16, #tpu.memory_space<vmem>>, vector<512x256xbf16>
    %c0_1 = arith.constant 0 : index
    %c0_2 = arith.constant 0 : index
    %1 = vector.load %arg2[%c0_1, %c0_2] : memref<256x128xbf16, #tpu.memory_space<vmem>>, vector<256x128xbf16>
    %cst = arith.constant dense<0.000000e+00> : vector<512x128xf32>
    %2 = tpu.matmul %0, %1, %cst {dimension_numbers = #tpu.dot_dimension_numbers<[1], [0], [0], [1], [0, 0, 1, 1], [], []>} : vector<512x256xbf16>, vector<256x128xbf16>, vector<512x128xf32> -> vector<512x128xf32>
    %c0_3 = arith.constant 0 : index
    %c0_4 = arith.constant 0 : index
    %3 = vector.load %arg3[%c0_3, %c0_4] : memref<1x128xf32, #tpu.memory_space<vmem>>, vector<1x128xf32>
    %4 = vector.broadcast %3 : vector<1x128xf32> to vector<512x128xf32>
    %5 = arith.addf %2, %4 : vector<512x128xf32>
    %cst_5 = arith.constant dense<0.000000e+00> : vector<512xf32>
    %6 = vector.multi_reduction <add>, %5, %cst_5 [1] : vector<512x128xf32> to vector<512xf32>
    %7 = vector.shape_cast %6 : vector<512xf32> to vector<512x1xf32>
    %cst_6 = arith.constant 1.280000e+02 : f32
    %8 = vector.broadcast %cst_6 : f32 to vector<512x1xf32>
    %9 = arith.divf %7, %8 : vector<512x1xf32>
    %10 = arith.mulf %5, %5 : vector<512x128xf32>
    %cst_7 = arith.constant dense<0.000000e+00> : vector<512xf32>
    %11 = vector.multi_reduction <add>, %10, %cst_7 [1] : vector<512x128xf32> to vector<512xf32>
    %12 = vector.shape_cast %11 : vector<512xf32> to vector<512x1xf32>
    %cst_8 = arith.constant 1.280000e+02 : f32
    %13 = vector.broadcast %cst_8 : f32 to vector<512x1xf32>
    %14 = arith.divf %12, %13 : vector<512x1xf32>
    %15 = arith.mulf %9, %9 : vector<512x1xf32>
    %16 = arith.subf %14, %15 : vector<512x1xf32>
    %cst_9 = arith.constant 0.000000e+00 : f32
    %17 = vector.broadcast %cst_9 : f32 to vector<512x1xf32>
    %18 = arith.maximumf %16, %17 : vector<512x1xf32>
    %19 = vector.broadcast %9 : vector<512x1xf32> to vector<512x128xf32>
    %20 = arith.subf %5, %19 : vector<512x128xf32>
    %cst_10 = arith.constant 9.99999974E-6 : f32
    %21 = vector.broadcast %cst_10 : f32 to vector<512x1xf32>
    %22 = arith.addf %18, %21 : vector<512x1xf32>
    %23 = math.rsqrt %22 : vector<512x1xf32>
    %24 = vector.broadcast %23 : vector<512x1xf32> to vector<512x128xf32>
    %25 = arith.mulf %20, %24 : vector<512x128xf32>
    %cst_11 = arith.constant 0.000000e+00 : f32
    %26 = vector.broadcast %cst_11 : f32 to vector<512x128xf32>
    %27 = arith.maximumf %25, %26 : vector<512x128xf32>
    %c0_12 = arith.constant 0 : index
    %c0_13 = arith.constant 0 : index
    %28 = vector.load %arg4[%c0_12, %c0_13] : memref<32x128xbf16, #tpu.memory_space<vmem>>, vector<32x128xbf16>
    %29 = arith.truncf %27 : vector<512x128xf32> to vector<512x128xbf16>
    %cst_14 = arith.constant dense<0.000000e+00> : vector<32x512xf32>
    %30 = tpu.matmul %28, %29, %cst_14 {dimension_numbers = #tpu.dot_dimension_numbers<[1], [1], [0], [0], [0, 0, 1, 0], [], []>} : vector<32x128xbf16>, vector<512x128xbf16>, vector<32x512xf32> -> vector<32x512xf32>
    %c0_15 = arith.constant 0 : index
    %c0_16 = arith.constant 0 : index
    %31 = vector.load %arg5[%c0_15, %c0_16] : memref<32x1xf32, #tpu.memory_space<vmem>>, vector<32x1xf32>
    %32 = vector.broadcast %31 : vector<32x1xf32> to vector<32x512xf32>
    %33 = arith.addf %30, %32 : vector<32x512xf32>
    %cst_17 = arith.constant dense<0.000000e+00> : vector<512xf32>
    %34 = vector.multi_reduction <add>, %33, %cst_17 [0] : vector<32x512xf32> to vector<512xf32>
    %35 = vector.shape_cast %34 : vector<512xf32> to vector<1x512xf32>
    %cst_18 = arith.constant 3.200000e+01 : f32
    %36 = vector.broadcast %cst_18 : f32 to vector<1x512xf32>
    %37 = arith.divf %35, %36 : vector<1x512xf32>
    %38 = arith.mulf %33, %33 : vector<32x512xf32>
    %cst_19 = arith.constant dense<0.000000e+00> : vector<512xf32>
    %39 = vector.multi_reduction <add>, %38, %cst_19 [0] : vector<32x512xf32> to vector<512xf32>
    %40 = vector.shape_cast %39 : vector<512xf32> to vector<1x512xf32>
    %cst_20 = arith.constant 3.200000e+01 : f32
    %41 = vector.broadcast %cst_20 : f32 to vector<1x512xf32>
    %42 = arith.divf %40, %41 : vector<1x512xf32>
    %43 = arith.mulf %37, %37 : vector<1x512xf32>
    %44 = arith.subf %42, %43 : vector<1x512xf32>
    %cst_21 = arith.constant 0.000000e+00 : f32
    %45 = vector.broadcast %cst_21 : f32 to vector<1x512xf32>
    %46 = arith.maximumf %44, %45 : vector<1x512xf32>
    %47 = vector.broadcast %37 : vector<1x512xf32> to vector<32x512xf32>
    %48 = arith.subf %33, %47 : vector<32x512xf32>
    %cst_22 = arith.constant 9.99999974E-6 : f32
    %49 = vector.broadcast %cst_22 : f32 to vector<1x512xf32>
    %50 = arith.addf %46, %49 : vector<1x512xf32>
    %51 = math.rsqrt %50 : vector<1x512xf32>
    %52 = vector.broadcast %51 : vector<1x512xf32> to vector<32x512xf32>
    %53 = arith.mulf %48, %52 : vector<32x512xf32>
    %cst_23 = arith.constant 0.000000e+00 : f32
    %54 = vector.broadcast %cst_23 : f32 to vector<32x512xf32>
    %55 = arith.maximumf %53, %54 : vector<32x512xf32>
    %c0_24 = arith.constant 0 : index
    %c0_25 = arith.constant 0 : index
    %56 = vector.load %arg6[%c0_24, %c0_25] : memref<3x32xf32, #tpu.memory_space<vmem>>, vector<3x32xf32>
    %cst_26 = arith.constant dense<0.000000e+00> : vector<3x512xf32>
    %57 = tpu.matmul %56, %55, %cst_26 {dimension_numbers = #tpu.dot_dimension_numbers<[1], [0], [0], [1], [0, 0, 1, 1], [], []>} : vector<3x32xf32>, vector<32x512xf32>, vector<3x512xf32> -> vector<3x512xf32>
    %c0_27 = arith.constant 0 : index
    %c0_28 = arith.constant 0 : index
    %58 = vector.load %arg7[%c0_27, %c0_28] : memref<3x1xf32, #tpu.memory_space<vmem>>, vector<3x1xf32>
    %59 = vector.broadcast %58 : vector<3x1xf32> to vector<3x512xf32>
    %60 = arith.addf %57, %59 : vector<3x512xf32>
    %c0_29 = arith.constant 0 : index
    %c0_30 = arith.constant 0 : index
    %61 = vector.load %arg8[%c0_29, %c0_30] : memref<3x512xf32, #tpu.memory_space<vmem>>, vector<3x512xf32>
    tpu.vector_store %arg8[%c0_29, %c0_30], %60 {strides = array<i32>} : memref<3x512xf32, #tpu.memory_space<vmem>>, vector<3x512xf32>,
    return
  }
  func.func @transform_0(%arg0: i32) -> (i32, i32) {
    %c0_i32 = arith.constant 0 : i32
    %c0_i32_0 = arith.constant 0 : i32
    return %arg0, %c0_i32 : i32, i32
  }
  func.func @transform_1(%arg0: i32) -> (i32, i32) {
    %c0_i32 = arith.constant 0 : i32
    %c0_i32_0 = arith.constant 0 : i32
    %c0_i32_1 = arith.constant 0 : i32
    return %c0_i32, %c0_i32_0 : i32, i32
  }
  func.func @transform_2(%arg0: i32) -> (i32, i32) {
    %c0_i32 = arith.constant 0 : i32
    %c0_i32_0 = arith.constant 0 : i32
    %c0_i32_1 = arith.constant 0 : i32
    return %c0_i32, %c0_i32_0 : i32, i32
  }
  func.func @transform_3(%arg0: i32) -> (i32, i32) {
    %c0_i32 = arith.constant 0 : i32
    %c0_i32_0 = arith.constant 0 : i32
    %c0_i32_1 = arith.constant 0 : i32
    return %c0_i32, %c0_i32_0 : i32, i32
  }
  func.func @transform_4(%arg0: i32) -> (i32, i32) {
    %c0_i32 = arith.constant 0 : i32
    %c0_i32_0 = arith.constant 0 : i32
    %c0_i32_1 = arith.constant 0 : i32
    return %c0_i32, %c0_i32_0 : i32, i32
  }
  func.func @transform_5(%arg0: i32) -> (i32, i32) {
    %c0_i32 = arith.constant 0 : i32
    %c0_i32_0 = arith.constant 0 : i32
    %c0_i32_1 = arith.constant 0 : i32
    return %c0_i32, %c0_i32_0 : i32, i32
  }
  func.func @transform_6(%arg0: i32) -> (i32, i32) {
    %c0_i32 = arith.constant 0 : i32
    %c0_i32_0 = arith.constant 0 : i32
    %c0_i32_1 = arith.constant 0 : i32
    return %c0_i32, %c0_i32_0 : i32, i32
  }
  func.func @transform_7(%arg0: i32) -> (i32, i32) {
    %c0_i32 = arith.constant 0 : i32
    %c0_i32_0 = arith.constant 0 : i32
    return %c0_i32, %arg0 : i32, i32
  }
}

</mosaic_0001>

<bundles_post_ra>
// kernel: final_block_pallas.1
= control target key start
LH: loop header
LB: loop body
LE: loop exit
PB: predicated region body
PF: predicated region fallthrough
CT: control target
= control target key end

     0   :  { %s3126_s24 = smov 0   ;;  %s4510_s0 = inlined_call_operand.vmem [shape: bf16[2000,256], index: 0, kind: input, shape index: {}]   ;;  %s4511_s1 = inlined_call_operand.vmem [shape: bf16[256,128], index: 1, kind: input, shape index: {}]   ;;  %s4512_s2 = inlined_call_operand.vmem [shape: f32[1,128], index: 2, kind: input, shape index: {}]   ;;  %s4513_s3 = inlined_call_operand.vmem [shape: bf16[32,128], index: 3, kind: input, shape index: {}]   ;;  %s4514_s4 = inlined_call_operand.vmem [shape: f32[32,1], index: 4, kind: input, shape index: {}]   ;;  %s4515_s5 = inlined_call_operand.vmem [shape: f32[3,32], index: 5, kind: input, shape index: {}]   ;;  %s4516_s6 = inlined_call_operand.vmem [shape: f32[3,1], index: 6, kind: input, shape index: {}]   ;;  %s4517_s7 = inlined_call_operand.vmem [shape: f32[3,2000], index: 7, kind: output, shape index: {}]  }
   0x1 LB: > { %s2642_s25 = sadd.s32 4294967295, %s3082_s24   ;;  %p2646_p0 = scmp.ge.s32.totalorder %s3082_s24, 1  ;;  %s3082_s24 = sphi %s3126_s24, %s17_s24  }
   0x2   : > { %p249_p1 = scmp.lt.s32.totalorder %s3082_s24, 5 }
   0x4   : > { %p250_p2 = pnand %p2646_p0, %p249_p1 }
   0x6   : > { %253 = sbr.rel (%p250_p2) target bundleno = 1160 (0x488), region = 48 }
   0xb   : > { %v2824_v0 = vld [vmem:[%s4511_s1 + $0x38] sm:$0xff]   ;;  %v3084_v1 = vmov 0   ;;  %s2647_s28 = sshll.u32 %s2642_s25, 6  ;;  %v2825_v2 = vld [vmem:[%s4511_s1 + $0x30] sm:$0xff]   ;;  %v2826_v3 = vld [vmem:[%s4511_s1 + $0x28] sm:$0xff]   ;;  %vm2430_vm0 = vcmask 261120  }
   0xc   : > { %830 = vmatprep.subr.bf16.mxu0 %v3084_v1  ;;  %2780 = vmatprep.subr.bf16.mxu1 %v3084_v1  ;;  %p293_p3 = scmp.lt.s32.totalorder %s2647_s28, 249  ;;  %v2827_v4 = vld [vmem:[%s4511_s1 + $0x20] sm:$0xff]   ;;  %v2828_v5 = vld [vmem:[%s4511_s1 + $0x18] sm:$0xff]   ;;  %v2829_v7 = vld [vmem:[%s4511_s1 + $0x10] sm:$0xff]   ;;  %s2650_s21 = sshll.u32 %s2642_s25, 2 }
   0xd   : > { %831 = vmatpush1.bf16.msra.mxu0 %v2824_v0  ;;  %2796 = vmatpush1.bf16.msra.mxu1 %v2824_v0  ;;  %v2830_v9 = vld [vmem:[%s4511_s1 + $0x8] sm:$0xff]   ;;  %v2831_v10 = vld [vmem:[%s4511_s1] sm:$0xff]   ;;  %v2832_v11 = vld [vmem:[%s4511_s1 + $0x78] sm:$0xff]   ;;  %p305_p4 = scmp.lt.s32.totalorder %s2650_s21, 15 }
   0xe   : > { %832 = vmatprep.subr.bf16.mxu0 %v3084_v1  ;;  %2781 = vmatprep.subr.bf16.mxu1 %v3084_v1  ;;  %s4644_s28 = smov (!%p293_p3, %s2647_s28), 249  ;;  %v2833_v12 = vld [vmem:[%s4511_s1 + $0x70] sm:$0xff]   ;;  %v2834_v13 = vld [vmem:[%s4511_s1 + $0x68] sm:$0xff]   ;;  %v2835_v14 = vld [vmem:[%s4511_s1 + $0x60] sm:$0xff]  }
   0xf   : > { %2823 = vset.pattern.permute.xlu1 %v3084_v1  ;;  %2822 = vset.pattern.permute.xlu0 %v3084_v1  ;;  %s2739_s12 = sshll.u32 %s4644_s28, 3  ;;  %v2836_v15 = vld [vmem:[%s4511_s1 + $0x58] sm:$0xff]   ;;  %v2837_v16 = vld [vmem:[%s4511_s1 + $0x50] sm:$0xff]   ;;  %v2838_v17 = vld [vmem:[%s4511_s1 + $0x48] sm:$0xff]   ;;  %s4646_s21 = smov (!%p305_p4, %s2650_s21), 15 }
  0x10   : > { %s3164_s17 = scalar_lea.vmem %s4510_s0, %s2739_s12  ;;  %v2839_v18 = vld [vmem:[%s4511_s1 + $0x40] sm:$0xff]  }
  0x11   : > { %833 = vmatpush1.bf16.msra.mxu0 %v2825_v2  ;;  %2797 = vmatpush1.bf16.msra.mxu1 %v2825_v2  ;;  %v2842_v6 = vld [vmem:[%s3164_s17 + $0x4] ss:$8 sps:$4 sm:$0xff]   ;;  %v2840_v19 = vld [vmem:[%s3164_s17] ss:$8 sps:$4 sm:$0xff]   ;;  %v2846_v21 = vld [vmem:[%s3164_s17 + $0x14] ss:$8 sps:$4 sm:$0xff]  }
  0x12   : > { %834 = vmatprep.subr.bf16.mxu0 %v3084_v1  ;;  %2782 = vmatprep.subr.bf16.mxu1 %v3084_v1  ;;  %v2845_v8 = vld [vmem:[%s3164_s17 + $0x164] ss:$8 sps:$4 sm:$0xff]   ;;  %v2843_v20 = vld [vmem:[%s3164_s17 + $0x160] ss:$8 sps:$4 sm:$0xff]   ;;  %v2848_v22 = vld [vmem:[%s3164_s17 + $0x174] ss:$8 sps:$4 sm:$0xff]  }
  0x13   : > { %862 = vmatprep.mubr.bf16.mxu0 %v2842_v6  ;;  %1038 = vmatprep.mubr.bf16.mxu1 %v2845_v8  ;;  %v2850_v23 = vld [vmem:[%s3164_s17 + $0x10] ss:$8 sps:$4 sm:$0xff]   ;;  %v2852_v25 = vld [vmem:[%s3164_s17 + $0x24] ss:$8 sps:$4 sm:$0xff]   ;;  %v2856_v27 = vld [vmem:[%s3164_s17 + $0x20] ss:$8 sps:$4 sm:$0xff]  }
  0x14   : > { %v2851_v24 = vld [vmem:[%s3164_s17 + $0x170] ss:$8 sps:$4 sm:$0xff]   ;;  %v2854_v26 = vld [vmem:[%s3164_s17 + $0x184] ss:$8 sps:$4 sm:$0xff]   ;;  %v2857_v28 = vld [vmem:[%s3164_s17 + $0x180] ss:$8 sps:$4 sm:$0xff]  }
  0x15   : > { %835 = vmatpush1.bf16.msra.mxu0 %v2826_v3  ;;  %2798 = vmatpush1.bf16.msra.mxu1 %v2826_v3  ;;  %v2858_v29 = vld [vmem:[%s3164_s17 + $0x34] ss:$8 sps:$4 sm:$0xff]   ;;  %v2862_v31 = vld [vmem:[%s3164_s17 + $0x30] ss:$8 sps:$4 sm:$0xff]   ;;  %v2864_v33 = vld [vmem:[%s3164_s17 + $0x44] ss:$8 sps:$4 sm:$0xff]  }
  0x16   : > { %836 = vmatprep.subr.bf16.mxu0 %v3084_v1  ;;  %2783 = vmatprep.subr.bf16.mxu1 %v3084_v1  ;;  %v2860_v30 = vld [vmem:[%s3164_s17 + $0x194] ss:$8 sps:$4 sm:$0xff]   ;;  %v2863_v32 = vld [vmem:[%s3164_s17 + $0x190] ss:$8 sps:$4 sm:$0xff]   ;;  %v2866_v34 = vld [vmem:[%s3164_s17 + $0x1a4] ss:$8 sps:$4 sm:$0xff]  }
  0x17   : > { %v2868_v35 = vld [vmem:[%s3164_s17 + $0x40] ss:$8 sps:$4 sm:$0xff]   ;;  %v2870_v37 = vld [vmem:[%s3164_s17 + $0x54] ss:$8 sps:$4 sm:$0xff]   ;;  %v2874_v39 = vld [vmem:[%s3164_s17 + $0x50] ss:$8 sps:$4 sm:$0xff]  }
  0x18   : > { %v2869_v36 = vld [vmem:[%s3164_s17 + $0x1a0] ss:$8 sps:$4 sm:$0xff]   ;;  %v2872_v38 = vld [vmem:[%s3164_s17 + $0x1b4] ss:$8 sps:$4 sm:$0xff]   ;;  %v2875_v40 = vld [vmem:[%s3164_s17 + $0x1b0] ss:$8 sps:$4 sm:$0xff]  }
  0x19   : > { %837 = vmatpush1.bf16.msra.mxu0 %v2827_v4  ;;  %2799 = vmatpush1.bf16.msra.mxu1 %v2827_v4  ;;  %v2876_v41 = vld [vmem:[%s3164_s17 + $0x64] ss:$8 sps:$4 sm:$0xff]   ;;  %v2880_v43 = vld [vmem:[%s3164_s17 + $0x60] ss:$8 sps:$4 sm:$0xff]   ;;  %v2882_v45 = vld [vmem:[%s3164_s17 + $0x74] ss:$8 sps:$4 sm:$0xff]  }
  0x1a   : > { %838 = vmatprep.subr.bf16.mxu0 %v3084_v1  ;;  %2784 = vmatprep.subr.bf16.mxu1 %v3084_v1  ;;  %v2878_v42 = vld [vmem:[%s3164_s17 + $0x1c4] ss:$8 sps:$4 sm:$0xff]   ;;  %v2881_v44 = vld [vmem:[%s3164_s17 + $0x1c0] ss:$8 sps:$4 sm:$0xff]   ;;  %v2884_v46 = vld [vmem:[%s3164_s17 + $0x1d4] ss:$8 sps:$4 sm:$0xff]  }
  0x1b   : > { %v2886_v47 = vld [vmem:[%s3164_s17 + $0x70] ss:$8 sps:$4 sm:$0xff]   ;;  %v2888_v49 = vld [vmem:[%s3164_s17 + $0x84] ss:$8 sps:$4 sm:$0xff]   ;;  %v2892_v51 = vld [vmem:[%s3164_s17 + $0x80] ss:$8 sps:$4 sm:$0xff]  }
  0x1c   : > { %v2887_v48 = vld [vmem:[%s3164_s17 + $0x1d0] ss:$8 sps:$4 sm:$0xff]   ;;  %v2890_v50 = vld [vmem:[%s3164_s17 + $0x1e4] ss:$8 sps:$4 sm:$0xff]   ;;  %v2893_v52 = vld [vmem:[%s3164_s17 + $0x1e0] ss:$8 sps:$4 sm:$0xff]  }
  0x1d   : > { %839 = vmatpush1.bf16.msra.mxu0 %v2828_v5  ;;  %2800 = vmatpush1.bf16.msra.mxu1 %v2828_v5  ;;  %v2894_v53 = vld [vmem:[%s3164_s17 + $0x94] ss:$8 sps:$4 sm:$0xff]   ;;  %v2898_v55 = vld [vmem:[%s3164_s17 + $0x90] ss:$8 sps:$4 sm:$0xff]   ;;  %v2900_v57 = vld [vmem:[%s3164_s17 + $0xa4] ss:$8 sps:$4 sm:$0xff]  }
  0x1e   : > { %840 = vmatprep.subr.bf16.mxu0 %v3084_v1  ;;  %2785 = vmatprep.subr.bf16.mxu1 %v3084_v1  ;;  %v2896_v54 = vld [vmem:[%s3164_s17 + $0x1f4] ss:$8 sps:$4 sm:$0xff]   ;;  %v2899_v56 = vld [vmem:[%s3164_s17 + $0x1f0] ss:$8 sps:$4 sm:$0xff]   ;;  %v2902_v58 = vld [vmem:[%s3164_s17 + $0xa0] ss:$8 sps:$4 sm:$0xff]  }
  0x1f   : > { %v2903_v59 = vld [vmem:[%s3164_s17 + $0xb4] ss:$8 sps:$4 sm:$0xff]   ;;  %v2905_v60 = vld [vmem:[%s3164_s17 + $0xb0] ss:$8 sps:$4 sm:$0xff]   ;;  %v2906_v61 = vld [vmem:[%s3164_s17 + $0xc4] ss:$8 sps:$4 sm:$0xff]  }
  0x20   : > { %v2908_v62 = vld [vmem:[%s3164_s17 + $0xc0] ss:$8 sps:$4 sm:$0xff]   ;;  %v2909_v63 = vld [vmem:[%s3164_s17 + $0xd4] ss:$8 sps:$4 sm:$0xff]   ;;  %v2911_v0 = vld [vmem:[%s3164_s17 + $0xd0] ss:$8 sps:$4 sm:$0xff]  }
  0x21   : > { %841 = vmatpush1.bf16.msra.mxu0 %v2829_v7  ;;  %2801 = vmatpush1.bf16.msra.mxu1 %v2829_v7  ;;  %v2914_v2 = vld [vmem:[%s3164_s17 + $0xe0] ss:$8 sps:$4 sm:$0xff]   ;;  %v2915_v3 = vld [vmem:[%s3164_s17 + $0xf4] ss:$8 sps:$4 sm:$0xff]   ;;  %v2917_v4 = vld [vmem:[%s3164_s17 + $0xf0] ss:$8 sps:$4 sm:$0xff]  }
  0x22   : > { %842 = vmatprep.subr.bf16.mxu0 %v3084_v1  ;;  %2786 = vmatprep.subr.bf16.mxu1 %v3084_v1  ;;  %v2918_v5 = vld [vmem:[%s3164_s17 + $0x104] ss:$8 sps:$4 sm:$0xff]   ;;  %v2920_v6 = vld [vmem:[%s3164_s17 + $0x100] ss:$8 sps:$4 sm:$0xff]   ;;  %v2921_v7 = vld [vmem:[%s3164_s17 + $0x114] ss:$8 sps:$4 sm:$0xff]  }
  0x23   : > { %v2923_v8 = vld [vmem:[%s3164_s17 + $0x110] ss:$8 sps:$4 sm:$0xff]  }
  0x25   : > { %843 = vmatpush1.bf16.msra.mxu0 %v2830_v9  ;;  %2802 = vmatpush1.bf16.msra.mxu1 %v2830_v9  ;;  %v2924_v9 = vld [vmem:[%s3164_s17 + $0x124] ss:$8 sps:$4 sm:$0xff]  }
  0x26   : > { %844 = vmatprep.subr.bf16.mxu0 %v3084_v1  ;;  %2787 = vmatprep.subr.bf16.mxu1 %v3084_v1 }
  0x29   : > { %845 = vmatpush1.bf16.msra.mxu0 %v2831_v10  ;;  %2803 = vmatpush1.bf16.msra.mxu1 %v2831_v10  ;;  %v2926_v10 = vld [vmem:[%s3164_s17 + $0x120] ss:$8 sps:$4 sm:$0xff]  }
  0x2a   : > { %846 = vmatprep.subr.bf16.mxu0 %v3084_v1  ;;  %2788 = vmatprep.subr.bf16.mxu1 %v3084_v1 }
  0x2d   : > { %847 = vmatpush2.bf16.msra.mxu0 %v2832_v11  ;;  %2804 = vmatpush2.bf16.msra.mxu1 %v2832_v11  ;;  %v2927_v11 = vld [vmem:[%s3164_s17 + $0x134] ss:$8 sps:$4 sm:$0xff]  }
  0x2e   : > { %848 = vmatprep.subr.bf16.mxu0 %v3084_v1  ;;  %2789 = vmatprep.subr.bf16.mxu1 %v3084_v1 }
  0x31   : > { %849 = vmatpush2.bf16.msra.mxu0 %v2833_v12  ;;  %2805 = vmatpush2.bf16.msra.mxu1 %v2833_v12  ;;  %v2929_v12 = vld [vmem:[%s3164_s17 + $0x130] ss:$8 sps:$4 sm:$0xff]  }
  0x32   : > { %850 = vmatprep.subr.bf16.mxu0 %v3084_v1  ;;  %2790 = vmatprep.subr.bf16.mxu1 %v3084_v1 }
  0x35   : > { %851 = vmatpush2.bf16.msra.mxu0 %v2834_v13  ;;  %2806 = vmatpush2.bf16.msra.mxu1 %v2834_v13  ;;  %v2930_v13 = vld [vmem:[%s3164_s17 + $0x144] ss:$8 sps:$4 sm:$0xff]  }
  0x36   : > { %852 = vmatprep.subr.bf16.mxu0 %v3084_v1  ;;  %2791 = vmatprep.subr.bf16.mxu1 %v3084_v1 }
  0x39   : > { %853 = vmatpush2.bf16.msra.mxu0 %v2835_v14  ;;  %2807 = vmatpush2.bf16.msra.mxu1 %v2835_v14  ;;  %v2932_v14 = vld [vmem:[%s3164_s17 + $0x140] ss:$8 sps:$4 sm:$0xff]  }
  0x3a   : > { %854 = vmatprep.subr.bf16.mxu0 %v3084_v1  ;;  %2792 = vmatprep.subr.bf16.mxu1 %v3084_v1 }
  0x3d   : > { %855 = vmatpush2.bf16.msra.mxu0 %v2836_v15  ;;  %2808 = vmatpush2.bf16.msra.mxu1 %v2836_v15  ;;  %v2933_v15 = vld [vmem:[%s3164_s17 + $0x154] ss:$8 sps:$4 sm:$0xff]  }
  0x3e   : > { %856 = vmatprep.subr.bf16.mxu0 %v3084_v1  ;;  %2793 = vmatprep.subr.bf16.mxu1 %v3084_v1 }
  0x41   : > { %857 = vmatpush2.bf16.msra.mxu0 %v2837_v16  ;;  %2809 = vmatpush2.bf16.msra.mxu1 %v2837_v16  ;;  %v2935_v16 = vld [vmem:[%s3164_s17 + $0x150] ss:$8 sps:$4 sm:$0xff]  }
  0x42   : > { %858 = vmatprep.subr.bf16.mxu0 %v3084_v1  ;;  %2794 = vmatprep.subr.bf16.mxu1 %v3084_v1 }
  0x45   : > { %859 = vmatpush2.bf16.msra.mxu0 %v2838_v17  ;;  %2810 = vmatpush2.bf16.msra.mxu1 %v2838_v17  ;;  %v3290_v17 = vld [vmem:[%s4512_s2] ss:$0 sm:$0xff] }
  0x46   : > { %860 = vmatprep.subr.bf16.mxu0 %v3084_v1  ;;  %2795 = vmatprep.subr.bf16.mxu1 %v3084_v1  ;;  %v2912_v1 = vld [vmem:[%s3164_s17 + $0xe4] ss:$8 sps:$4 sm:$0xff]   ;;  %s2651_s17 = sshll.u32 %s4646_s21, 2 }
  0x47   : > { %s308_s26 = scalar_lea.vmem %s4517_s7, %s2651_s17 }
  0x49   : > { %861 = vmatpush2.bf16.msra.mxu0 %v2839_v18  ;;  %2811 = vmatpush2.bf16.msra.mxu1 %v2839_v18 }
  0x4c   : > { %863 = vmatmul.mubr.bf16.vlgmr.msra.gmra.mxu0 %v2840_v19  ;;  %1039 = vmatmul.mubr.bf16.vlgmr.msra.gmra.mxu1 %v2843_v20 }
  0x4d   : > { %870 = vmatprep.mubr.bf16.mxu0 %v2846_v21  ;;  %1046 = vmatprep.mubr.bf16.mxu1 %v2848_v22 }
  0x54   : > { %871 = vmatmul.mubr.bf16.gmra.mxu0 %v2850_v23  ;;  %1047 = vmatmul.mubr.bf16.gmra.mxu1 %v2851_v24 }
  0x55   : > { %878 = vmatprep.mubr.bf16.mxu0 %v2852_v25  ;;  %1054 = vmatprep.mubr.bf16.mxu1 %v2854_v26 }
  0x5c   : > { %879 = vmatmul.mubr.bf16.gmra.mxu0 %v2856_v27  ;;  %1055 = vmatmul.mubr.bf16.gmra.mxu1 %v2857_v28 }
  0x5d   : > { %886 = vmatprep.mubr.bf16.mxu0 %v2858_v29  ;;  %1062 = vmatprep.mubr.bf16.mxu1 %v2860_v30 }
  0x64   : > { %887 = vmatmul.mubr.bf16.gmra.mxu0 %v2862_v31  ;;  %1063 = vmatmul.mubr.bf16.gmra.mxu1 %v2863_v32 }
  0x65   : > { %894 = vmatprep.mubr.bf16.mxu0 %v2864_v33  ;;  %1070 = vmatprep.mubr.bf16.mxu1 %v2866_v34 }
  0x6c   : > { %895 = vmatmul.mubr.bf16.gmra.mxu0 %v2868_v35  ;;  %1071 = vmatmul.mubr.bf16.gmra.mxu1 %v2869_v36 }
  0x6d   : > { %902 = vmatprep.mubr.bf16.mxu0 %v2870_v37  ;;  %1078 = vmatprep.mubr.bf16.mxu1 %v2872_v38 }
  0x74   : > { %903 = vmatmul.mubr.bf16.gmra.mxu0 %v2874_v39  ;;  %1079 = vmatmul.mubr.bf16.gmra.mxu1 %v2875_v40 }
  0x75   : > { %910 = vmatprep.mubr.bf16.mxu0 %v2876_v41  ;;  %1086 = vmatprep.mubr.bf16.mxu1 %v2878_v42 }
  0x7c   : > { %911 = vmatmul.mubr.bf16.gmra.mxu0 %v2880_v43  ;;  %1087 = vmatmul.mubr.bf16.gmra.mxu1 %v2881_v44 }
  0x7d   : > { %918 = vmatprep.mubr.bf16.mxu0 %v2882_v45  ;;  %1094 = vmatprep.mubr.bf16.mxu1 %v2884_v46 }
  0x84   : > { %919 = vmatmul.mubr.bf16.gmra.mxu0 %v2886_v47  ;;  %1095 = vmatmul.mubr.bf16.gmra.mxu1 %v2887_v48 }
  0x85   : > { %926 = vmatprep.mubr.bf16.mxu0 %v2888_v49  ;;  %1102 = vmatprep.mubr.bf16.mxu1 %v2890_v50 }
  0x8c   : > { %927 = vmatmul.mubr.bf16.gmra.mxu0 %v2892_v51  ;;  %1103 = vmatmul.mubr.bf16.gmra.mxu1 %v2893_v52 }
  0x8d   : > { %934 = vmatprep.mubr.bf16.mxu0 %v2894_v53  ;;  %1110 = vmatprep.mubr.bf16.mxu1 %v2896_v54 }
  0x94   : > { %935 = vmatmul.mubr.bf16.gmra.mxu0 %v2898_v55  ;;  %1111 = vmatmul.mubr.bf16.gmra.mxu1 %v2899_v56 }
  0x95   : > { %942 = vmatprep.mubr.bf16.mxu0 %v2900_v57 }
  0x9c   : > { %943 = vmatmul.mubr.bf16.gmra.mxu0 %v2902_v58 }
  0x9d   : > { %950 = vmatprep.mubr.bf16.mxu0 %v2903_v59 }
  0xa4   : > { %951 = vmatmul.mubr.bf16.gmra.mxu0 %v2905_v60 }
  0xa5   : > { %958 = vmatprep.mubr.bf16.mxu0 %v2906_v61 }
  0xac   : > { %959 = vmatmul.mubr.bf16.gmra.mxu0 %v2908_v62 }
  0xad   : > { %966 = vmatprep.mubr.bf16.mxu0 %v2909_v63 }
  0xb4   : > { %967 = vmatmul.mubr.bf16.gmra.mxu0 %v2911_v0 }
  0xb5   : > { %974 = vmatprep.mubr.bf16.mxu0 %v2912_v1 }
  0xbc   : > { %975 = vmatmul.mubr.bf16.gmra.mxu0 %v2914_v2 }
  0xbd   : > { %982 = vmatprep.mubr.bf16.mxu0 %v2915_v3 }
  0xc4   : > { %983 = vmatmul.mubr.bf16.gmra.mxu0 %v2917_v4 }
  0xc5   : > { %990 = vmatprep.mubr.bf16.mxu0 %v2918_v5 }
  0xcc   : > { %991 = vmatmul.mubr.bf16.gmra.mxu0 %v2920_v6 }
  0xcd   : > { %998 = vmatprep.mubr.bf16.mxu0 %v2921_v7 }
  0xd4   : > { %999 = vmatmul.mubr.bf16.gmra.mxu0 %v2923_v8 }
  0xd5   : > { %1006 = vmatprep.mubr.bf16.mxu0 %v2924_v9 }
  0xdc   : > { %1007 = vmatmul.mubr.bf16.gmra.mxu0 %v2926_v10 }
  0xdd   : > { %1014 = vmatprep.mubr.bf16.mxu0 %v2927_v11 }
  0xe4   : > { %1015 = vmatmul.mubr.bf16.gmra.mxu0 %v2929_v12 }
  0xe5   : > { %1022 = vmatprep.mubr.bf16.mxu0 %v2930_v13 }
  0xec   : > { %1023 = vmatmul.mubr.bf16.gmra.mxu0 %v2932_v14 }
  0xed   : > { %1030 = vmatprep.mubr.bf16.mxu0 %v2933_v15 }
  0xf4   : > { %1031 = vmatmul.mubr.bf16.gmra.mxu0 %v2935_v16 }
 0x10c   : > { %v864_v18 = vpop.f32.mrf.mxu0  ;;  %v3292_v19 = vpop.f32.mrf.mxu1 }
 0x10d   : > { %v3295_v20 = vadd.f32 %v3290_v17, %v864_v18 }
 0x10e   : > { %v866_v21 = vpop.f32.mrf.mxu0  ;;  %v1042_v22 = vpop.f32.mrf.mxu1 }
 0x10f   : > { %1119 = vadd.xlane.f32.xlu0 %v3295_v20  ;;  %v1312_v26 = vmul.f32 %v3295_v20, %v3295_v20 }
 0x110   : > { %v867_v23 = vpop.f32.mrf.mxu0  ;;  %v3298_v24 = vpop.f32.mrf.mxu1 }
 0x111   : > { %v3301_v25 = vadd.f32 %v3290_v17, %v867_v23 }
 0x112   : > { %v869_v27 = vpop.f32.mrf.mxu0  ;;  %v1045_v28 = vpop.f32.mrf.mxu1 }
 0x113   : > { %1121 = vadd.xlane.f32.xlu1 %v3301_v25  ;;  %1376 = vadd.xlane.f32.xlu0 %v1312_v26  ;;  %v1313_v32 = vmul.f32 %v3301_v25, %v3301_v25 }
 0x114   : > { %v872_v29 = vpop.f32.mrf.mxu0  ;;  %v3306_v30 = vpop.f32.mrf.mxu1 }
 0x115   : > { %v3309_v31 = vadd.f32 %v3290_v17, %v872_v29 }
 0x116   : > { %v874_v33 = vpop.f32.mrf.mxu0  ;;  %v1050_v34 = vpop.f32.mrf.mxu1 }
 0x117   : > { %1378 = vadd.xlane.f32.xlu1 %v1313_v32  ;;  %1123 = vadd.xlane.f32.xlu0 %v3309_v31  ;;  %v1314_v38 = vmul.f32 %v3309_v31, %v3309_v31 }
 0x118   : > { %v875_v35 = vpop.f32.mrf.mxu0  ;;  %v3314_v36 = vpop.f32.mrf.mxu1 }
 0x119   : > { %v3317_v37 = vadd.f32 %v3290_v17, %v875_v35 }
 0x11a   : > { %v877_v39 = vpop.f32.mrf.mxu0  ;;  %v1053_v40 = vpop.f32.mrf.mxu1 }
 0x11b   : > { %1125 = vadd.xlane.f32.xlu1 %v3317_v37  ;;  %1380 = vadd.xlane.f32.xlu0 %v1314_v38  ;;  %v1315_v44 = vmul.f32 %v3317_v37, %v3317_v37 }
 0x11c   : > { %v880_v41 = vpop.f32.mrf.mxu0  ;;  %v3322_v42 = vpop.f32.mrf.mxu1 }
 0x11d   : > { %v3325_v43 = vadd.f32 %v3290_v17, %v880_v41 }
 0x11e   : > { %v882_v45 = vpop.f32.mrf.mxu0  ;;  %v1058_v46 = vpop.f32.mrf.mxu1 }
 0x11f   : > { %1382 = vadd.xlane.f32.xlu1 %v1315_v44  ;;  %1127 = vadd.xlane.f32.xlu0 %v3325_v43  ;;  %v1316_v50 = vmul.f32 %v3325_v43, %v3325_v43 }
 0x120   : > { %v883_v47 = vpop.f32.mrf.mxu0  ;;  %v3330_v48 = vpop.f32.mrf.mxu1 }
 0x121   : > { %v3333_v49 = vadd.f32 %v3290_v17, %v883_v47 }
 0x122   : > { %v885_v51 = vpop.f32.mrf.mxu0  ;;  %v1061_v52 = vpop.f32.mrf.mxu1 }
 0x123   : > { %1129 = vadd.xlane.f32.xlu1 %v3333_v49  ;;  %1384 = vadd.xlane.f32.xlu0 %v1316_v50  ;;  %v1317_v56 = vmul.f32 %v3333_v49, %v3333_v49 }
 0x124   : > { %v888_v53 = vpop.f32.mrf.mxu0  ;;  %v3338_v54 = vpop.f32.mrf.mxu1 }
 0x125   : > { %v3341_v55 = vadd.f32 %v3290_v17, %v888_v53 }
 0x126   : > { %v890_v57 = vpop.f32.mrf.mxu0  ;;  %v1066_v58 = vpop.f32.mrf.mxu1 }
 0x127   : > { %1386 = vadd.xlane.f32.xlu1 %v1317_v56  ;;  %1131 = vadd.xlane.f32.xlu0 %v3341_v55  ;;  %v1318_v62 = vmul.f32 %v3341_v55, %v3341_v55 }
 0x128   : > { %v891_v59 = vpop.f32.mrf.mxu0  ;;  %v3346_v60 = vpop.f32.mrf.mxu1 }
 0x129   : > { %v3349_v61 = vadd.f32 %v3290_v17, %v891_v59 }
 0x12a   : > { %v893_v63 = vpop.f32.mrf.mxu0  ;;  %v1069_v0 = vpop.f32.mrf.mxu1 }
 0x12b   : > { %1133 = vadd.xlane.f32.xlu1 %v3349_v61  ;;  %1388 = vadd.xlane.f32.xlu0 %v1318_v62  ;;  %v1319_v4 = vmul.f32 %v3349_v61, %v3349_v61 }
 0x12c   : > { %v896_v1 = vpop.f32.mrf.mxu0  ;;  %v3354_v2 = vpop.f32.mrf.mxu1 }
 0x12d   : > { %v3357_v3 = vadd.f32 %v3290_v17, %v896_v1 }
 0x12e   : > { %v898_v5 = vpop.f32.mrf.mxu0  ;;  %v1074_v6 = vpop.f32.mrf.mxu1 }
 0x12f   : > { %1390 = vadd.xlane.f32.xlu1 %v1319_v4  ;;  %1135 = vadd.xlane.f32.xlu0 %v3357_v3  ;;  %v1320_v10 = vmul.f32 %v3357_v3, %v3357_v3 }
 0x130   : > { %v899_v7 = vpop.f32.mrf.mxu0  ;;  %v3362_v8 = vpop.f32.mrf.mxu1 }
 0x131   : > { %v3365_v9 = vadd.f32 %v3290_v17, %v899_v7 }
 0x132   : > { %v901_v11 = vpop.f32.mrf.mxu0  ;;  %v1077_v12 = vpop.f32.mrf.mxu1 }
 0x133   : > { %1137 = vadd.xlane.f32.xlu1 %v3365_v9  ;;  %1392 = vadd.xlane.f32.xlu0 %v1320_v10  ;;  %v1321_v16 = vmul.f32 %v3365_v9, %v3365_v9 }
 0x134   : > { %v904_v13 = vpop.f32.mrf.mxu0  ;;  %v3370_v14 = vpop.f32.mrf.mxu1 }
 0x135   : > { %v3373_v15 = vadd.f32 %v3290_v17, %v904_v13 }
 0x136   : > { %v906_v18 = vpop.f32.mrf.mxu0  ;;  %v1082_v21 = vpop.f32.mrf.mxu1 }
 0x137   : > { %1394 = vadd.xlane.f32.xlu1 %v1321_v16  ;;  %1139 = vadd.xlane.f32.xlu0 %v3373_v15  ;;  %v1322_v27 = vmul.f32 %v3373_v15, %v3373_v15 }
 0x138   : > { %v907_v22 = vpop.f32.mrf.mxu0  ;;  %v3378_v23 = vpop.f32.mrf.mxu1 }
 0x139   : > { %v3381_v26 = vadd.f32 %v3290_v17, %v907_v22 }
 0x13a   : > { %v909_v28 = vpop.f32.mrf.mxu0  ;;  %v1085_v29 = vpop.f32.mrf.mxu1 }
 0x13b   : > { %1141 = vadd.xlane.f32.xlu1 %v3381_v26  ;;  %1396 = vadd.xlane.f32.xlu0 %v1322_v27  ;;  %v1323_v35 = vmul.f32 %v3381_v26, %v3381_v26 }
 0x13c   : > { %v912_v32 = vpop.f32.mrf.mxu0  ;;  %v3386_v33 = vpop.f32.mrf.mxu1 }
 0x13d   : > { %v3389_v34 = vadd.f32 %v3290_v17, %v912_v32 }
 0x13e   : > { %v914_v38 = vpop.f32.mrf.mxu0  ;;  %v1090_v39 = vpop.f32.mrf.mxu1 }
 0x13f   : > { %1398 = vadd.xlane.f32.xlu1 %v1323_v35  ;;  %1143 = vadd.xlane.f32.xlu0 %v3389_v34  ;;  %v1324_v45 = vmul.f32 %v3389_v34, %v3389_v34 }
 0x140   : > { %v915_v40 = vpop.f32.mrf.mxu0  ;;  %v3394_v41 = vpop.f32.mrf.mxu1 }
 0x141   : > { %v3397_v44 = vadd.f32 %v3290_v17, %v915_v40 }
 0x142   : > { %v917_v46 = vpop.f32.mrf.mxu0  ;;  %v1093_v47 = vpop.f32.mrf.mxu1 }
 0x143   : > { %1145 = vadd.xlane.f32.xlu1 %v3397_v44  ;;  %1400 = vadd.xlane.f32.xlu0 %v1324_v45  ;;  %v1325_v53 = vmul.f32 %v3397_v44, %v3397_v44 }
 0x144   : > { %v920_v50 = vpop.f32.mrf.mxu0  ;;  %v3402_v51 = vpop.f32.mrf.mxu1 }
 0x145   : > { %v3405_v52 = vadd.f32 %v3290_v17, %v920_v50 }
 0x146   : > { %v922_v56 = vpop.f32.mrf.mxu0  ;;  %v1098_v57 = vpop.f32.mrf.mxu1 }
 0x147   : > { %1402 = vadd.xlane.f32.xlu1 %v1325_v53  ;;  %v1326_v58 = vmul.f32 %v3405_v52, %v3405_v52 }
 0x148   : > { %v923_v59 = vpop.f32.mrf.mxu0  ;;  %v3411_v62 = vpop.f32.mrf.mxu1 }
 0x149   : > { %1404 = vadd.xlane.f32.xlu0 %v1326_v58  ;;  %v3417_v5 = vadd.f32 %v3290_v17, %v923_v59 }
 0x14a   : > { %v925_v63 = vpop.f32.mrf.mxu0  ;;  %v1101_v0 = vpop.f32.mrf.mxu1 }
 0x14b   : > { %1147 = vadd.xlane.f32.xlu1 %v3405_v52  ;;  %4561 = vst [vmem:[#allocation2_spill] sm:$0xff] %v3417_v5  ;;  %v1327_v13 = vmul.f32 %v3417_v5, %v3417_v5 }
 0x14c   : > { %v928_v1 = vpop.f32.mrf.mxu0  ;;  %v3414_v4 = vpop.f32.mrf.mxu1 }
 0x14d   : > { %v3420_v6 = vadd.f32 %v3290_v17, %v928_v1 }
 0x14e   : > { %v930_v7 = vpop.f32.mrf.mxu0  ;;  %v1106_v10 = vpop.f32.mrf.mxu1 }
 0x14f   : > { %4562 = vst [vmem:[#allocation3_spill] sm:$0xff] %v3420_v6  ;;  %1149 = vadd.xlane.f32.xlu1 %v3417_v5  ;;  %1151 = vadd.xlane.f32.xlu0 %v3420_v6  ;;  %v1328_v16 = vmul.f32 %v3420_v6, %v3420_v6 }
 0x150   : > { %v931_v11 = vpop.f32.mrf.mxu0  ;;  %v3424_v12 = vpop.f32.mrf.mxu1 }
 0x151   : > { %v3431_v28 = vadd.f32 %v3290_v17, %v931_v11 }
 0x152   : > { %v933_v18 = vpop.f32.mrf.mxu0  ;;  %v1109_v21 = vpop.f32.mrf.mxu1 }
 0x153   : > { %1406 = vadd.xlane.f32.xlu1 %v1327_v13  ;;  %1408 = vadd.xlane.f32.xlu0 %v1328_v16  ;;  %4563 = vst [vmem:[#allocation4_spill] sm:$0xff] %v3431_v28  ;;  %v1329_v45 = vmul.f32 %v3431_v28, %v3431_v28 }
 0x154   : > { %v936_v22 = vpop.f32.mrf.mxu0  ;;  %v1112_v27 = vpop.f32.mrf.mxu1 }
 0x155   : > { %v3434_v29 = vadd.f32 %v3290_v17, %v936_v22  ;;  %v3437_v38 = vadd.f32 %v3290_v17, %v1112_v27 }
 0x156   : > { %v938_v32 = vpop.f32.mrf.mxu0  ;;  %v1114_v35 = vpop.f32.mrf.mxu1 }
 0x157   : > { %4564 = vst [vmem:[#allocation5_spill] sm:$0xff] %v3437_v38  ;;  %1153 = vadd.xlane.f32.xlu1 %v3431_v28  ;;  %1155 = vadd.xlane.f32.xlu0 %v3434_v29  ;;  %v1330_v56 = vmul.f32 %v3434_v29, %v3434_v29 }
 0x158   : > { %v939_v39 = vpop.f32.mrf.mxu0  ;;  %v1115_v40 = vpop.f32.mrf.mxu1 }
 0x159   : > { %v3445_v53 = vadd.f32 %v3290_v17, %v939_v39  ;;  %v3454_v63 = vadd.f32 %v3290_v17, %v1115_v40 }
 0x15a   : > { %v941_v46 = vpop.f32.mrf.mxu0  ;;  %v1117_v47 = vpop.f32.mrf.mxu1 }
 0x15b   : > { %1410 = vadd.xlane.f32.xlu1 %v1329_v45  ;;  %1243 = vadd.xlane.f32.xlu0 %v3437_v38  ;;  %4565 = vst [vmem:[#allocation6_spill] sm:$0xff] %v3454_v63  ;;  %v1331_v7 = vmul.f32 %v3445_v53, %v3445_v53 }
 0x15c   : > { %v944_v50 = vpop.f32.mrf.mxu0 }
 0x15d   : > { %v3450_v58 = vadd.f32 %v3290_v17, %v944_v50 }
 0x15e   : > { %v946_v57 = vpop.f32.mrf.mxu0 }
 0x15f   : > { %1157 = vadd.xlane.f32.xlu1 %v3445_v53  ;;  %1412 = vadd.xlane.f32.xlu0 %v1330_v56  ;;  %v1332_v10 = vmul.f32 %v3450_v58, %v3450_v58 }
 0x160   : > { %v947_v59 = vpop.f32.mrf.mxu0 }
 0x161   : > { %v3466_v18 = vadd.f32 %v3290_v17, %v947_v59 }
 0x162   : > { %v949_v0 = vpop.f32.mrf.mxu0 }
 0x163   : > { %1245 = vadd.xlane.f32.xlu1 %v3454_v63  ;;  %1159 = vadd.xlane.f32.xlu0 %v3450_v58  ;;  %4567 = vst [vmem:[#allocation8_spill] sm:$0xff] %v3466_v18  ;;  %v1333_v27 = vmul.f32 %v3466_v18, %v3466_v18 }
 0x164   : > { %v952_v1 = vpop.f32.mrf.mxu0 }
 0x165   : > { %v3463_v13 = vadd.f32 %v3290_v17, %v952_v1 }
 0x166   : > { %v954_v11 = vpop.f32.mrf.mxu0 }
 0x167   : > { %4566 = vst [vmem:[#allocation7_spill] sm:$0xff] %v3463_v13  ;;  %1414 = vadd.xlane.f32.xlu1 %v1331_v7  ;;  %1416 = vadd.xlane.f32.xlu0 %v1332_v10  ;;  %v1334_v32 = vmul.f32 %v3463_v13, %v3463_v13 }
 0x168   : > { %v955_v16 = vpop.f32.mrf.mxu0 }
 0x169   : > { %v3478_v45 = vadd.f32 %v3290_v17, %v955_v16 }
 0x16a   : > { %v957_v21 = vpop.f32.mrf.mxu0 }
 0x16b   : > { %1161 = vadd.xlane.f32.xlu1 %v3466_v18  ;;  %1163 = vadd.xlane.f32.xlu0 %v3463_v13  ;;  %4569 = vst [vmem:[#allocation10_spill] sm:$0xff] %v3478_v45  ;;  %v1335_v50 = vmul.f32 %v3478_v45, %v3478_v45  ;;  %v3646_v13 = vadd.f32 %v3290_v17, %v3386_v33 }
 0x16c   : > { %v960_v22 = vpop.f32.mrf.mxu0 }
 0x16d   : > { %v3475_v39 = vadd.f32 %v3290_v17, %v960_v22  ;;  %4585 = vst [vmem:[#allocation26_spill] sm:$0xff] %v3646_v13 }
 0x16e   : > { %v962_v35 = vpop.f32.mrf.mxu0 }
 0x16f   : > { %4568 = vst [vmem:[#allocation9_spill] sm:$0xff] %v3475_v39  ;;  %1418 = vadd.xlane.f32.xlu1 %v1333_v27  ;;  %1420 = vadd.xlane.f32.xlu0 %v1334_v32  ;;  %v1336_v56 = vmul.f32 %v3475_v39, %v3475_v39 }
 0x170   : > { %v963_v40 = vpop.f32.mrf.mxu0 }
 0x171   : > { %v3490_v1 = vadd.f32 %v3290_v17, %v963_v40 }
 0x172   : > { %v965_v46 = vpop.f32.mrf.mxu0 }
 0x173   : > { %1165 = vadd.xlane.f32.xlu1 %v3478_v45  ;;  %1167 = vadd.xlane.f32.xlu0 %v3475_v39  ;;  %4571 = vst [vmem:[#allocation12_spill] sm:$0xff] %v3490_v1  ;;  %v1337_v11 = vmul.f32 %v3490_v1, %v3490_v1 }
 0x174   : > { %v968_v47 = vpop.f32.mrf.mxu0 }
 0x175   : > { %v3487_v59 = vadd.f32 %v3290_v17, %v968_v47 }
 0x176   : > { %v970_v57 = vpop.f32.mrf.mxu0 }
 0x177   : > { %4570 = vst [vmem:[#allocation11_spill] sm:$0xff] %v3487_v59  ;;  %1422 = vadd.xlane.f32.xlu1 %v1335_v50  ;;  %1424 = vadd.xlane.f32.xlu0 %v1336_v56  ;;  %v1338_v16 = vmul.f32 %v3487_v59, %v3487_v59 }
 0x178   : > { %v971_v0 = vpop.f32.mrf.mxu0 }
 0x179   : > { %v3502_v32 = vadd.f32 %v3290_v17, %v971_v0 }
 0x17a   : > { %v973_v7 = vpop.f32.mrf.mxu0 }
 0x17b   : > { %1169 = vadd.xlane.f32.xlu1 %v3490_v1  ;;  %1171 = vadd.xlane.f32.xlu0 %v3487_v59  ;;  %4573 = vst [vmem:[#allocation14_spill] sm:$0xff] %v3502_v32  ;;  %v1339_v46 = vmul.f32 %v3502_v32, %v3502_v32 }
 0x17c   : > { %v976_v10 = vpop.f32.mrf.mxu0 }
 0x17d   : > { %v3499_v22 = vadd.f32 %v3290_v17, %v976_v10 }
 0x17e   : > { %v978_v21 = vpop.f32.mrf.mxu0 }
 0x17f   : > { %4572 = vst [vmem:[#allocation13_spill] sm:$0xff] %v3499_v22  ;;  %1426 = vadd.xlane.f32.xlu1 %v1337_v11  ;;  %1428 = vadd.xlane.f32.xlu0 %v1338_v16  ;;  %v1340_v47 = vmul.f32 %v3499_v22, %v3499_v22 }
 0x180   : > { %v979_v27 = vpop.f32.mrf.mxu0 }
 0x181   : > { %v3514_v0 = vadd.f32 %v3290_v17, %v979_v27 }
 0x182   : > { %v981_v35 = vpop.f32.mrf.mxu0 }
 0x183   : > { %1173 = vadd.xlane.f32.xlu1 %v3502_v32  ;;  %1175 = vadd.xlane.f32.xlu0 %v3499_v22  ;;  %4575 = vst [vmem:[#allocation16_spill] sm:$0xff] %v3514_v0  ;;  %v1341_v16 = vmul.f32 %v3514_v0, %v3514_v0 }
 0x184   : > { %v984_v40 = vpop.f32.mrf.mxu0 }
 0x185   : > { %v3511_v56 = vadd.f32 %v3290_v17, %v984_v40 }
 0x186   : > { %v986_v50 = vpop.f32.mrf.mxu0 }
 0x187   : > { %4574 = vst [vmem:[#allocation15_spill] sm:$0xff] %v3511_v56  ;;  %1430 = vadd.xlane.f32.xlu1 %v1339_v46  ;;  %1432 = vadd.xlane.f32.xlu0 %v1340_v47  ;;  %v1342_v21 = vmul.f32 %v3511_v56, %v3511_v56  ;;  %v3536_v50 = vadd.f32 %v3290_v17, %v3306_v30 }
 0x188   : > { %v987_v57 = vpop.f32.mrf.mxu0  ;;  %v1374_v30 = vmul.f32 %v3437_v38, %v3437_v38 }
 0x189   : > { %v3521_v11 = vadd.f32 %v3290_v17, %v987_v57  ;;  %4577 = vst [vmem:[#allocation18_spill] sm:$0xff] %v3536_v50  ;;  %v3540_v57 = vadd.f32 %v3290_v17, %v3314_v36  ;;  %v1358_v6 = vmul.f32 %v3536_v50, %v3536_v50 }
 0x18a   : > { %v989_v7 = vpop.f32.mrf.mxu0 }
 0x18b   : > { %1177 = vadd.xlane.f32.xlu1 %v3514_v0  ;;  %1179 = vadd.xlane.f32.xlu0 %v3511_v56  ;;  %4576 = vst [vmem:[#allocation17_spill] sm:$0xff] %v3521_v11  ;;  %v1343_v40 = vmul.f32 %v3521_v11, %v3521_v11  ;;  %4578 = vst [vmem:[#allocation19_spill] sm:$0xff] %v3540_v57  ;;  %v1359_v39 = vmul.f32 %v3540_v57, %v3540_v57 }
 0x18c   : > { %v3518_v10 = vpop.f32.mrf.mxu0 }
 0x18e   : > { %v994_v35 = vpop.f32.mrf.mxu0 }
 0x18f   : > { %1434 = vadd.xlane.f32.xlu1 %v1341_v16  ;;  %1436 = vadd.xlane.f32.xlu0 %v1342_v21 }
 0x190   : > { %v3527_v27 = vpop.f32.mrf.mxu0 }
 0x192   : > { %v997_v46 = vpop.f32.mrf.mxu0 }
 0x193   : > { %1438 = vadd.xlane.f32.xlu1 %v1343_v40  ;;  %1181 = vadd.xlane.f32.xlu0 %v3521_v11  ;;  %v1375_v40 = vmul.f32 %v3454_v63, %v3454_v63 }
 0x194   : > { %v3532_v47 = vpop.f32.mrf.mxu0 }
 0x196   : > { %v1002_v7 = vpop.f32.mrf.mxu0 }
 0x197   : > { %1213 = vadd.xlane.f32.xlu1 %v3540_v57  ;;  %1211 = vadd.xlane.f32.xlu0 %v3536_v50 }
 0x198   : > { %v1120_v16 = vpop.xlane.xlu0 %1119  ;;  %v3544_v21 = vpop.f32.mrf.mxu0 }
 0x199   : > { %v3546_v35 = vmul.f32 0.0078125, %v1120_v16 }
 0x19a   : > { %v1005_v46 = vpop.f32.mrf.mxu0 }
 0x19b   : > { %1502 = vadd.xlane.f32.xlu1 %v1375_v40  ;;  %1500 = vadd.xlane.f32.xlu0 %v1374_v30  ;;  %v1568_v28 = vmul.f32 %v3546_v35, %v3546_v35  ;;  %v3564_v30 = vadd.f32 %v3290_v17, %v3414_v4  ;;  %v3568_v46 = vadd.f32 %v3290_v17, %v3424_v12 }
 0x19c   : > { %v1122_v36 = vpop.xlane.xlu1 %1121  ;;  %v1377_v7 = vpop.xlane.xlu0 %1376  ;;  %v3580_v12 = vadd.f32 %v3290_v17, %v3292_v19 }
 0x19d   : > { %v3556_v45 = vmul.f32 0.0078125, %v1122_v36  ;;  %v1504_v16 = vmul.f32 0.0078125, %v1377_v7  ;;  %v3560_v1 = vpop.f32.mrf.mxu0  ;;  %4579 = vst [vmem:[#allocation20_spill] sm:$0xff] %v3564_v30  ;;  %4580 = vst [vmem:[#allocation21_spill] sm:$0xff] %v3568_v46 }
 0x19e   : > { %4581 = vst [vmem:[#allocation22_spill] sm:$0xff] %v3580_v12 }
 0x19f   : > { %v1632_v59 = vsub.f32 %v1504_v16, %v1568_v28  ;;  %1470 = vadd.xlane.f32.xlu1 %v1359_v39  ;;  %1468 = vadd.xlane.f32.xlu0 %v1358_v6  ;;  %v1010_v40 = vpop.f32.mrf.mxu0  ;;  %v1569_v7 = vmul.f32 %v3556_v45, %v3556_v45  ;;  %v3584_v16 = vadd.f32 %v3290_v17, %v3298_v24 }
 0x1a0   : > { %v1379_v36 = vpop.xlane.xlu1 %1378  ;;  %v1124_v50 = vpop.xlane.xlu0 %1123 }
 0x1a1   : > { %v1696_v57 = vmax.f32 %v1632_v59, 0.0  ;;  %v1505_v32 = vmul.f32 0.0078125, %v1379_v36  ;;  %v3572_v63 = vmul.f32 0.0078125, %v1124_v50  ;;  %v3574_v28 = vpop.f32.mrf.mxu0  ;;  %4582 = vst [vmem:[#allocation23_spill] sm:$0xff] %v3584_v16 }
 0x1a3   : > { %v1824_v6 = vadd.f32 1e-05, %v1696_v57  ;;  %v1633_v39 = vsub.f32 %v1505_v32, %v1569_v7  ;;  %1241 = vadd.xlane.f32.xlu1 %v3568_v46  ;;  %1239 = vadd.xlane.f32.xlu0 %v3564_v30  ;;  %v1013_v4 = vpop.f32.mrf.mxu0  ;;  %v1570_v59 = vmul.f32 %v3572_v63, %v3572_v63 }
 0x1a4   : > { %v1126_v50 = vpop.xlane.xlu1 %1125  ;;  %v1381_v40 = vpop.xlane.xlu0 %1380 }
 0x1a5   : > { %2938 = vrsqrt.f32 %v1824_v6  ;;  %v1697_v32 = vmax.f32 %v1633_v39, 0.0  ;;  %v3588_v57 = vmul.f32 0.0078125, %v1126_v50  ;;  %v1506_v36 = vmul.f32 0.0078125, %v1381_v40  ;;  %v3590_v7 = vpop.f32.mrf.mxu0 }
 0x1a6   : > { %v1373_v6 = vmul.f32 %v3568_v46, %v3568_v46  ;;  %v1372_v39 = vmul.f32 %v3564_v30, %v3564_v30  ;;  %v1357_v30 = vmul.f32 %v3584_v16, %v3584_v16 }
 0x1a7   : > { %v1825_v4 = vadd.f32 1e-05, %v1697_v32  ;;  %v1634_v38 = vsub.f32 %v1506_v36, %v1570_v59  ;;  %1209 = vadd.xlane.f32.xlu1 %v3584_v16  ;;  %1207 = vadd.xlane.f32.xlu0 %v3580_v12  ;;  %v1018_v19 = vpop.f32.mrf.mxu0  ;;  %v1571_v24 = vmul.f32 %v3588_v57, %v3588_v57 }
 0x1a8   : > { %v1383_v22 = vpop.xlane.xlu1 %1382  ;;  %v1128_v11 = vpop.xlane.xlu0 %1127 }
 0x1a9   : > { %2940 = vrsqrt.f32 %v1825_v4  ;;  %v1698_v50 = vmax.f32 %v1634_v38, 0.0  ;;  %v1507_v40 = vmul.f32 0.0078125, %v1383_v22  ;;  %v3600_v59 = vmul.f32 0.0078125, %v1128_v11  ;;  %v3602_v32 = vpop.f32.mrf.mxu0 }
 0x1aa   : > { %v1356_v38 = vmul.f32 %v3580_v12, %v3580_v12 }
 0x1ab   : > { %v1826_v36 = vadd.f32 1e-05, %v1698_v50  ;;  %v1635_v19 = vsub.f32 %v1507_v40, %v1571_v24  ;;  %1498 = vadd.xlane.f32.xlu1 %v1373_v6  ;;  %1496 = vadd.xlane.f32.xlu0 %v1372_v39  ;;  %v1021_v56 = vpop.f32.mrf.mxu0  ;;  %v1572_v0 = vmul.f32 %v3600_v59, %v3600_v59  ;;  %v3616_v50 = vadd.f32 %v3290_v17, %v3402_v51 }
 0x1ac   : > { %v1130_v5 = vpop.xlane.xlu1 %1129  ;;  %v1385_v46 = vpop.xlane.xlu0 %1384  ;;  %v3620_v40 = vadd.f32 %v3290_v17, %v3411_v62  ;;  %v1760_v51 = vsub.f32 %v3295_v20, %v3546_v35 }
 0x1ad   : > { %2942 = vrsqrt.f32 %v1826_v36  ;;  %v1699_v22 = vmax.f32 %v1635_v19, 0.0  ;;  %v3610_v11 = vmul.f32 0.0078125, %v1130_v5  ;;  %v1508_v4 = vmul.f32 0.0078125, %v1385_v46  ;;  %v3612_v24 = vpop.f32.mrf.mxu0  ;;  %4583 = vst [vmem:[#allocation24_spill] sm:$0xff] %v3616_v50 }
 0x1ae   : > { %4584 = vst [vmem:[#allocation25_spill] sm:$0xff] %v3620_v40  ;;  %v1370_v12 = vmul.f32 %v3616_v50, %v3616_v50 }
 0x1af   : > { %v1827_v6 = vadd.f32 1e-05, %v1699_v22  ;;  %v1636_v56 = vsub.f32 %v1508_v4, %v1572_v0  ;;  %1466 = vadd.xlane.f32.xlu1 %v1357_v30  ;;  %1464 = vadd.xlane.f32.xlu0 %v1356_v38  ;;  %v1026_v39 = vpop.f32.mrf.mxu0  ;;  %v1573_v5 = vmul.f32 %v3610_v11, %v3610_v11 }
 0x1b0   : > { %v1387_v36 = vpop.xlane.xlu1 %1386  ;;  %v1132_v46 = vpop.xlane.xlu0 %1131 }
 0x1b1   : > { %2944 = vrsqrt.f32 %v1827_v6  ;;  %v1700_v19 = vmax.f32 %v1636_v56, 0.0  ;;  %v1509_v22 = vmul.f32 0.0078125, %v1387_v36  ;;  %v3624_v0 = vmul.f32 0.0078125, %v1132_v46  ;;  %v3626_v30 = vpop.f32.mrf.mxu0 }
 0x1b2   : > { %v2939_v38 = vpop.eup %2938  ;;  %v1371_v46 = vmul.f32 %v3620_v40, %v3620_v40 }
 0x1b3   : > { %v1828_v4 = vadd.f32 1e-05, %v1700_v19  ;;  %v1637_v39 = vsub.f32 %v1509_v22, %v1573_v5  ;;  %1237 = vadd.xlane.f32.xlu1 %v3620_v40  ;;  %1235 = vadd.xlane.f32.xlu0 %v3616_v50  ;;  %v1029_v62 = vpop.f32.mrf.mxu0  ;;  %v1574_v6 = vmul.f32 %v3624_v0, %v3624_v0  ;;  %v1952_v16 = vmul.f32 %v2939_v38, %v1760_v51 }
 0x1b4   : > { %v1134_v56 = vpop.xlane.xlu1 %1133  ;;  %v1389_v36 = vpop.xlane.xlu0 %1388  ;;  %v1761_v62 = vsub.f32 %v3301_v25, %v3556_v45  ;;  %v3650_v51 = vadd.f32 %v3290_v17, %v3394_v41 }
 0x1b5   : > { %2946 = vrsqrt.f32 %v1828_v4  ;;  %v1701_v20 = vmax.f32 %v1637_v39, 0.0  ;;  %v3638_v35 = vmul.f32 0.0078125, %v1134_v56  ;;  %v1510_v5 = vmul.f32 0.0078125, %v1389_v36  ;;  %v3640_v19 = vpop.f32.mrf.mxu0 }
 0x1b6   : > { %v2941_v22 = vpop.eup %2940 }
 0x1b7   : > { %v1829_v40 = vadd.f32 1e-05, %v1701_v20  ;;  %v1638_v18 = vsub.f32 %v1510_v5, %v1574_v6  ;;  %1494 = vadd.xlane.f32.xlu1 %v1371_v46  ;;  %1492 = vadd.xlane.f32.xlu0 %v1370_v12  ;;  %v1034_v38 = vpop.f32.mrf.mxu0  ;;  %v1575_v4 = vmul.f32 %v3638_v35, %v3638_v35  ;;  %v1953_v36 = vmul.f32 %v2941_v22, %v1761_v62 }
 0x1b8   : > { %v1391_v39 = vpop.xlane.xlu1 %1390  ;;  %v1136_v56 = vpop.xlane.xlu0 %1135  ;;  %v1762_v12 = vsub.f32 %v3309_v31, %v3572_v63  ;;  %v2016_v46 = vmax.f32 %v1952_v16, 0.0  ;;  %v1369_v31 = vmul.f32 %v3650_v51, %v3650_v51 }
 0x1b9   : > { %2948 = vrsqrt.f32 %v1829_v40  ;;  %v1702_v25 = vmax.f32 %v1638_v18, 0.0  ;;  %v1511_v45 = vmul.f32 0.0078125, %v1391_v39  ;;  %v3654_v33 = vmul.f32 0.0078125, %v1136_v56  ;;  %v3656_v20 = vpop.f32.mrf.mxu0 }
 0x1ba   : > { %v2943_v6 = vpop.eup %2942  ;;  %v2017_v41 = vmax.f32 %v1953_v36, 0.0  ;;  %v1368_v18 = vmul.f32 %v3646_v13, %v3646_v13 }
 0x1bb   : > { %v1830_v5 = vadd.f32 1e-05, %v1702_v25  ;;  %v1639_v38 = vsub.f32 %v1511_v45, %v1575_v4  ;;  %1233 = vadd.xlane.f32.xlu1 %v3650_v51  ;;  %1231 = vadd.xlane.f32.xlu0 %v3646_v13  ;;  %v1037_v40 = vpop.f32.mrf.mxu0  ;;  %v1576_v22 = vmul.f32 %v3654_v33, %v3654_v33  ;;  %v1954_v63 = vmul.f32 %v2943_v6, %v1762_v12 }
 0x1bc   : > { %v1138_v62 = vpop.xlane.xlu1 %1137  ;;  %v1393_v39 = vpop.xlane.xlu0 %1392  ;;  %v3668_v16 = vpack.c.bf16 %v2017_v41, %v2016_v46  ;;  %v1763_v45 = vsub.f32 %v3317_v37, %v3588_v57  ;;  %v3676_v40 = vadd.f32 %v3290_v17, %v3370_v14  ;;  %v3680_v6 = vadd.f32 %v3290_v17, %v3378_v23 }
 0x1bd   : > { %2950 = vrsqrt.f32 %v1830_v5  ;;  %v1703_v4 = vmax.f32 %v1639_v38, 0.0  ;;  %v3670_v56 = vmul.f32 0.0078125, %v1138_v62  ;;  %v1512_v36 = vmul.f32 0.0078125, %v1393_v39 }
 0x1be   : > { %v2945_v25 = vpop.eup %2944 }
 0x1bf   : > { %v1831_v13 = vadd.f32 1e-05, %v1703_v4  ;;  %v1640_v50 = vsub.f32 %v1512_v36, %v1576_v22  ;;  %1490 = vadd.xlane.f32.xlu1 %v1369_v31  ;;  %1488 = vadd.xlane.f32.xlu0 %v1368_v18  ;;  %v1577_v12 = vmul.f32 %v3670_v56, %v3670_v56  ;;  %v1955_v5 = vmul.f32 %v2945_v25, %v1763_v45 }
 0x1c0   : > { %v1395_v46 = vpop.xlane.xlu1 %1394  ;;  %v1140_v41 = vpop.xlane.xlu0 %1139  ;;  %v1764_v22 = vsub.f32 %v3325_v43, %v3600_v59  ;;  %v2018_v18 = vmax.f32 %v1954_v63, 0.0  ;;  %v1366_v31 = vmul.f32 %v3676_v40, %v3676_v40  ;;  %v1367_v36 = vmul.f32 %v3680_v6, %v3680_v6 }
 0x1c1   : > { %2952 = vrsqrt.f32 %v1831_v13  ;;  %v1704_v37 = vmax.f32 %v1640_v50, 0.0  ;;  %v1513_v57 = vmul.f32 0.0078125, %v1395_v46  ;;  %v3684_v38 = vmul.f32 0.0078125, %v1140_v41 }
 0x1c2   : > { %v2947_v14 = vpop.eup %2946  ;;  %v2019_v62 = vmax.f32 %v1955_v5, 0.0  ;;  %v1765_v46 = vsub.f32 %v3333_v49, %v3610_v11 }
 0x1c3   : > { %v1832_v39 = vadd.f32 1e-05, %v1704_v37  ;;  %v1641_v23 = vsub.f32 %v1513_v57, %v1577_v12  ;;  %1229 = vadd.xlane.f32.xlu1 %v3680_v6  ;;  %1227 = vadd.xlane.f32.xlu0 %v3676_v40  ;;  %v1578_v13 = vmul.f32 %v3684_v38, %v3684_v38  ;;  %v1956_v43 = vmul.f32 %v2947_v14, %v1764_v22 }
 0x1c4   : > { %v1142_v50 = vpop.xlane.xlu1 %1141  ;;  %v1397_v4 = vpop.xlane.xlu0 %1396  ;;  %v3696_v59 = vpack.c.bf16 %v2019_v62, %v2018_v18  ;;  %v3704_v37 = vadd.f32 %v3290_v17, %v3354_v2  ;;  %v3708_v57 = vadd.f32 %v3290_v17, %v3362_v8  ;;  %v1766_v2 = vsub.f32 %v3341_v55, %v3624_v0 }
 0x1c5   : > { %2954 = vrsqrt.f32 %v1832_v39  ;;  %v1705_v63 = vmax.f32 %v1641_v23, 0.0  ;;  %v3698_v25 = vmul.f32 0.0078125, %v1142_v50  ;;  %v1514_v45 = vmul.f32 0.0078125, %v1397_v4 }
 0x1c6   : > { %v2949_v12 = vpop.eup %2948  ;;  %4586 = vst [vmem:[#allocation27_spill] sm:$0xff] %v3704_v37  ;;  %4587 = vst [vmem:[#allocation28_spill] sm:$0xff] %v3708_v57  ;;  %v3718_v8 = vadd.f32 %v3290_v17, %v3560_v1 }
 0x1c7   : > { %v1833_v41 = vadd.f32 1e-05, %v1705_v63  ;;  %v1642_v5 = vsub.f32 %v1514_v45, %v1578_v13  ;;  %1486 = vadd.xlane.f32.xlu1 %v1367_v36  ;;  %1484 = vadd.xlane.f32.xlu0 %v1366_v31  ;;  %v1579_v14 = vmul.f32 %v3698_v25, %v3698_v25  ;;  %v1957_v62 = vmul.f32 %v2949_v12, %v1765_v46 }
 0x1c8   : > { %v1399_v22 = vpop.xlane.xlu1 %1398  ;;  %v1144_v18 = vpop.xlane.xlu0 %1143  ;;  %v2020_v31 = vmax.f32 %v1956_v43, 0.0  ;;  %4588 = vst [vmem:[#allocation29_spill] sm:$0xff] %v3718_v8  ;;  %v3724_v36 = vadd.f32 %v3290_v17, %v3574_v28 }
 0x1c9   : > { %2956 = vrsqrt.f32 %v1833_v41  ;;  %v1706_v49 = vmax.f32 %v1642_v5, 0.0  ;;  %v1515_v11 = vmul.f32 0.0078125, %v1399_v22  ;;  %v3712_v39 = vmul.f32 0.0078125, %v1144_v18 }
 0x1ca   : > { %v2951_v23 = vpop.eup %2950  ;;  %v2021_v13 = vmax.f32 %v1957_v62, 0.0  ;;  %4589 = vst [vmem:[#allocation30_spill] sm:$0xff] %v3724_v36  ;;  %v1767_v5 = vsub.f32 %v3349_v61, %v3638_v35  ;;  %v1768_v22 = vsub.f32 %v3357_v3, %v3654_v33  ;;  %v3740_v18 = vadd.f32 %v3290_v17, %v3590_v7 }
 0x1cb   : > { %v1834_v50 = vadd.f32 1e-05, %v1706_v49  ;;  %v1643_v4 = vsub.f32 %v1515_v11, %v1579_v14  ;;  %1225 = vadd.xlane.f32.xlu1 %v3708_v57  ;;  %1223 = vadd.xlane.f32.xlu0 %v3704_v37  ;;  %v1580_v63 = vmul.f32 %v3712_v39, %v3712_v39  ;;  %v1958_v43 = vmul.f32 %v2951_v23, %v1766_v2 }
 0x1cc   : > { %v1146_v55 = vpop.xlane.xlu1 %1145  ;;  %v1401_v0 = vpop.xlane.xlu0 %1400  ;;  %v3728_v45 = vpack.c.bf16 %v2021_v13, %v2020_v31  ;;  %4590 = vst [vmem:[#allocation31_spill] sm:$0xff] %v3740_v18  ;;  %v3744_v62 = vadd.f32 %v3290_v17, %v3602_v32 }
 0x1cd   : > { %2958 = vrsqrt.f32 %v1834_v50  ;;  %v1707_v1 = vmax.f32 %v1643_v4, 0.0  ;;  %v3730_v12 = vmul.f32 0.0078125, %v1146_v55  ;;  %v1516_v46 = vmul.f32 0.0078125, %v1401_v0 }
 0x1ce   : > { %v2953_v41 = vpop.eup %2952  ;;  %4591 = vst [vmem:[#allocation32_spill] sm:$0xff] %v3744_v62  ;;  %v2022_v31 = vmax.f32 %v1958_v43, 0.0  ;;  %v1351_v4 = vmul.f32 %v3744_v62, %v3744_v62  ;;  %v1769_v0 = vsub.f32 %v3365_v9, %v3670_v56  ;;  %v3768_v9 = vadd.f32 %v3290_v17, %v3612_v24 }
 0x1cf   : > { %v1835_v14 = vadd.f32 1e-05, %v1707_v1  ;;  %v1644_v28 = vsub.f32 %v1516_v46, %v1580_v63  ;;  %1193 = vadd.xlane.f32.xlu1 %v3724_v36  ;;  %1191 = vadd.xlane.f32.xlu0 %v3718_v8  ;;  %v1959_v11 = vmul.f32 %v2953_v41, %v1767_v5  ;;  %v1581_v61 = vmul.f32 %v3730_v12, %v3730_v12 }
 0x1d0   : > { %v1403_v49 = vpop.xlane.xlu1 %1402  ;;  %v1350_v63 = vmul.f32 %v3740_v18, %v3740_v18 }
 0x1d1   : > { %2960 = vrsqrt.f32 %v1835_v14  ;;  %v1708_v35 = vmax.f32 %v1644_v28, 0.0  ;;  %v1517_v23 = vmul.f32 0.0078125, %v1403_v49  ;;  %v2023_v13 = vmax.f32 %v1959_v11, 0.0 }
 0x1d2   : > { %v2955_v2 = vpop.eup %2954  ;;  %v1405_v32 = vpop.xlane.xlu0 %1404  ;;  %v3772_v11 = vadd.f32 %v3290_v17, %v3626_v30  ;;  %v1771_v17 = vsub.f32 %v3381_v26, %v3698_v25 }
 0x1d3   : > { %v1836_v3 = vadd.f32 1e-05, %v1708_v35  ;;  %v1645_v33 = vsub.f32 %v1517_v23, %v1581_v61  ;;  %1197 = vadd.xlane.f32.xlu1 %v3744_v62  ;;  %1195 = vadd.xlane.f32.xlu0 %v3740_v18  ;;  %v1960_v7 = vmul.f32 %v2955_v2, %v1768_v22  ;;  %v3754_v55 = vpack.c.bf16 %v2023_v13, %v2022_v31  ;;  %v4608_v18 = vld [vmem:[#allocation13_spill] sm:$0xff] }
 0x1d4   : > { %v1148_v50 = vpop.xlane.xlu1 %1147  ;;  %v1518_v5 = vmul.f32 0.0078125, %v1405_v32  ;;  %v1770_v35 = vsub.f32 %v3373_v15, %v3684_v38  ;;  %v1353_v15 = vmul.f32 %v3772_v11, %v3772_v11  ;;  %v1352_v38 = vmul.f32 %v3768_v9, %v3768_v9 }
 0x1d5   : > { %2962 = vrsqrt.f32 %v1836_v3  ;;  %v1709_v43 = vmax.f32 %v1645_v33, 0.0  ;;  %v3758_v1 = vmul.f32 0.0078125, %v1148_v50  ;;  %v2024_v23 = vmax.f32 %v1960_v7, 0.0 }
 0x1d6   : > { %v2957_v46 = vpop.eup %2956 }
 0x1d7   : > { %v1837_v41 = vadd.f32 1e-05, %v1709_v43  ;;  %v1582_v14 = vmul.f32 %v3758_v1, %v3758_v1  ;;  %1454 = vadd.xlane.f32.xlu1 %v1351_v4  ;;  %1452 = vadd.xlane.f32.xlu0 %v1350_v63  ;;  %v1961_v28 = vmul.f32 %v2957_v46, %v1769_v0  ;;  %v3795_v63 = vld [vmem:[%s4512_s2] ss:$0 sm:$0xff]  ;;  %v1772_v43 = vsub.f32 %v3389_v34, %v3712_v39 }
 0x1d8   : > { %v3762_v22 = vpop.xlane.xlu1 %1149  ;;  %v3764_v49 = vpop.xlane.xlu0 %1151  ;;  %v3799_v26 = vadd.f32 %v3795_v63, %v3640_v19  ;;  %v3803_v25 = vadd.f32 %v3795_v63, %v3656_v20 }
 0x1d9   : > { %2964 = vrsqrt.f32 %v1837_v41  ;;  %v1646_v56 = vsub.f32 %v1518_v5, %v1582_v14  ;;  %v2025_v2 = vmax.f32 %v1961_v28, 0.0 }
 0x1da   : > { %v2959_v61 = vpop.eup %2958  ;;  %4592 = vst [vmem:[#allocation33_spill] sm:$0xff] %v3799_v26  ;;  %4593 = vst [vmem:[#allocation34_spill] sm:$0xff] %v3803_v25  ;;  %v1355_v20 = vmul.f32 %v3803_v25, %v3803_v25  ;;  %v1354_v34 = vmul.f32 %v3799_v26, %v3799_v26 }
 0x1db   : > { %v1710_v31 = vmax.f32 %v1646_v56, 0.0  ;;  %1201 = vadd.xlane.f32.xlu1 %v3772_v11  ;;  %1199 = vadd.xlane.f32.xlu0 %v3768_v9  ;;  %v1962_v3 = vmul.f32 %v2959_v61, %v1770_v35  ;;  %v3782_v33 = vpack.c.bf16 %v2025_v2, %v2024_v23  ;;  %v1773_v61 = vsub.f32 %v3397_v44, %v3730_v12 }
 0x1dc   : > { %v3778_v13 = vpop.xlane.xlu1 %1406  ;;  %v3780_v24 = vpop.xlane.xlu0 %1408  ;;  %v1774_v44 = vsub.f32 %v3405_v52, %v3758_v1  ;;  %v1348_v52 = vmul.f32 %v3718_v8, %v3718_v8 }
 0x1dd   : > { %v1838_v30 = vadd.f32 1e-05, %v1710_v31  ;;  %v2026_v46 = vmax.f32 %v1962_v3, 0.0 }
 0x1de   : > { %v2961_v7 = vpop.eup %2960 }
 0x1df   : > { %2966 = vrsqrt.f32 %v1838_v30  ;;  %1458 = vadd.xlane.f32.xlu1 %v1353_v15  ;;  %1456 = vadd.xlane.f32.xlu0 %v1352_v38  ;;  %v1963_v32 = vmul.f32 %v2961_v7, %v1771_v17  ;;  %v1365_v17 = vmul.f32 %v3708_v57, %v3708_v57  ;;  %v1364_v30 = vmul.f32 %v3704_v37, %v3704_v37 }
 0x1e0   : > { %v3790_v50 = vpop.xlane.xlu1 %1153  ;;  %v1156_v4 = vpop.xlane.xlu0 %1155 }
 0x1e1   : > { %v2027_v41 = vmax.f32 %v1963_v32, 0.0  ;;  %v3815_v56 = vmul.f32 0.0078125, %v1156_v4 }
 0x1e2   : > { %v2963_v0 = vpop.eup %2962 }
 0x1e3   : > { %1205 = vadd.xlane.f32.xlu1 %v3803_v25  ;;  %1203 = vadd.xlane.f32.xlu0 %v3799_v26  ;;  %v1964_v19 = vmul.f32 %v2963_v0, %v1772_v43  ;;  %v3813_v28 = vpack.c.bf16 %v2027_v41, %v2026_v46  ;;  %v1586_v31 = vmul.f32 %v3815_v56, %v3815_v56 }
 0x1e4   : > { %v3809_v5 = vpop.xlane.xlu1 %1410  ;;  %v3811_v14 = vpop.xlane.xlu0 %1243 }
 0x1e5   : > { %v2028_v15 = vmax.f32 %v1964_v19, 0.0  ;;  %v1349_v19 = vmul.f32 %v3724_v36, %v3724_v36 }
 0x1e6   : > { %v2965_v39 = vpop.eup %2964 }
 0x1e7   : > { %1462 = vadd.xlane.f32.xlu1 %v1355_v20  ;;  %1460 = vadd.xlane.f32.xlu0 %v1354_v34  ;;  %v1965_v2 = vmul.f32 %v2965_v39, %v1773_v61  ;;  %v3847_v34 = vadd.f32 %v3795_v63, %v3338_v54  ;;  %v3851_v39 = vadd.f32 %v3795_v63, %v3346_v60 }
 0x1e8   : > { %v1158_v35 = vpop.xlane.xlu1 %1157  ;;  %v1413_v23 = vpop.xlane.xlu0 %1412  ;;  %v3861_v54 = vadd.f32 %v3795_v63, %v3532_v47  ;;  %v3865_v60 = vadd.f32 %v3795_v63, %v3544_v21 }
 0x1e9   : > { %v1522_v3 = vmul.f32 0.0078125, %v1413_v23  ;;  %v2029_v38 = vmax.f32 %v1965_v2, 0.0  ;;  %v3831_v32 = vmul.f32 0.0078125, %v1158_v35  ;;  %4594 = vst [vmem:[#allocation35_spill] sm:$0xff] %v3847_v34  ;;  %4595 = vst [vmem:[#allocation36_spill] sm:$0xff] %v3851_v39 }
 0x1ea   : > { %4596 = vst [vmem:[#allocation37_spill] sm:$0xff] %v3861_v54  ;;  %4597 = vst [vmem:[#allocation38_spill] sm:$0xff] %v3865_v60 }
 0x1eb   : > { %v1650_v12 = vsub.f32 %v1522_v3, %v1586_v31  ;;  %1482 = vadd.xlane.f32.xlu1 %v1365_v17  ;;  %1480 = vadd.xlane.f32.xlu0 %v1364_v30  ;;  %v3835_v43 = vpack.c.bf16 %v2029_v38, %v2028_v15  ;;  %v1587_v61 = vmul.f32 %v3831_v32, %v3831_v32 }
 0x1ec   : > { %v2967_v7 = vpop.eup %2966  ;;  %v3833_v4 = vpop.xlane.xlu1 %1245 }
 0x1ed   : > { %v1160_v0 = vpop.xlane.xlu0 %1159  ;;  %v3837_v46 = vmul.f32 %v2967_v7, %v1774_v44  ;;  %v1714_v41 = vmax.f32 %v1650_v12, 0.0 }
 0x1ee   : > { %v3843_v1 = vmul.f32 0.0078125, %v1160_v0 }
 0x1ef   : > { %v1842_v20 = vadd.f32 1e-05, %v1714_v41  ;;  %1450 = vadd.xlane.f32.xlu1 %v1349_v19  ;;  %1448 = vadd.xlane.f32.xlu0 %v1348_v52 }
 0x1f0   : > { %v1415_v35 = vpop.xlane.xlu1 %1414  ;;  %v1588_v2 = vmul.f32 %v3843_v1, %v3843_v1 }
 0x1f1   : > { %v1417_v23 = vpop.xlane.xlu0 %1416  ;;  %2968 = vrsqrt.f32 %v1842_v20  ;;  %v1523_v31 = vmul.f32 0.0078125, %v1415_v35  ;;  %v1363_v20 = vmul.f32 %v3851_v39, %v3851_v39 }
 0x1f2   : > { %v1524_v3 = vmul.f32 0.0078125, %v1417_v23 }
 0x1f3   : > { %v1651_v17 = vsub.f32 %v1523_v31, %v1587_v61  ;;  %1221 = vadd.xlane.f32.xlu1 %v3851_v39  ;;  %1219 = vadd.xlane.f32.xlu0 %v3847_v34  ;;  %v1362_v61 = vmul.f32 %v3847_v34, %v3847_v34  ;;  %v3884_v31 = vld [vmem:[%s4513_s3] sm:$0xff]  }
 0x1f4   : > { %v1652_v30 = vsub.f32 %v1524_v3, %v1588_v2  ;;  %v1162_v15 = vpop.xlane.xlu1 %1161  ;;  %2756 = vmatprep.mubr.bf16.mxu1 %v3884_v31 }
 0x1f5   : > { %v1164_v38 = vpop.xlane.xlu0 %1163  ;;  %v1715_v44 = vmax.f32 %v1651_v17, 0.0  ;;  %v3867_v7 = vmul.f32 0.0078125, %v1162_v15 }
 0x1f6   : > { %v1716_v12 = vmax.f32 %v1652_v30, 0.0  ;;  %v3869_v0 = vmul.f32 0.0078125, %v1164_v38 }
 0x1f7   : > { %v1843_v41 = vadd.f32 1e-05, %v1715_v44  ;;  %1189 = vadd.xlane.f32.xlu1 %v3865_v60  ;;  %1187 = vadd.xlane.f32.xlu0 %v3861_v54  ;;  %v1589_v47 = vmul.f32 %v3867_v7, %v3867_v7 }
 0x1f8   : > { %v1844_v19 = vadd.f32 1e-05, %v1716_v12  ;;  %v1419_v52 = vpop.xlane.xlu1 %1418  ;;  %v1590_v35 = vmul.f32 %v3869_v0, %v3869_v0  ;;  %v1347_v12 = vmul.f32 %v3865_v60, %v3865_v60 }
 0x1f9   : > { %v1421_v21 = vpop.xlane.xlu0 %1420  ;;  %2970 = vrsqrt.f32 %v1843_v41  ;;  %v1525_v23 = vmul.f32 0.0078125, %v1419_v52  ;;  %v1346_v41 = vmul.f32 %v3861_v54, %v3861_v54 }
 0x1fa   : > { %v1526_v2 = vmul.f32 0.0078125, %v1421_v21  ;;  %2972 = vrsqrt.f32 %v1844_v19  ;;  %v1778_v19 = vsub.f32 %v3434_v29, %v3815_v56 }
 0x1fb   : > { %v1653_v3 = vsub.f32 %v1525_v23, %v1589_v47  ;;  %1478 = vadd.xlane.f32.xlu1 %v1363_v20  ;;  %1476 = vadd.xlane.f32.xlu0 %v1362_v61  ;;  %v3903_v23 = vadd.f32 %v3795_v63, %v3322_v42  ;;  %v3919_v42 = vadd.f32 %v3795_v63, %v3527_v27 }
 0x1fc   : > { %v1654_v17 = vsub.f32 %v1526_v2, %v1590_v35  ;;  %v3886_v30 = vpop.xlane.xlu1 %1165  ;;  %v3907_v2 = vadd.f32 %v3795_v63, %v3330_v48  ;;  %v1779_v48 = vsub.f32 %v3445_v53, %v3831_v32 }
 0x1fd   : > { %v3888_v15 = vpop.xlane.xlu0 %1167  ;;  %v1717_v38 = vmax.f32 %v1653_v3, 0.0  ;;  %4598 = vst [vmem:[#allocation39_spill] sm:$0xff] %v3903_v23  ;;  %v3915_v3 = vadd.f32 %v3795_v63, %v3518_v10  ;;  %4601 = vst [vmem:[#allocation42_spill] sm:$0xff] %v3919_v42  ;;  %v1360_v63 = vmul.f32 %v3903_v23, %v3903_v23 }
 0x1fe   : > { %v1718_v44 = vmax.f32 %v1654_v17, 0.0  ;;  %v2969_v52 = vpop.eup %2968  ;;  %4599 = vst [vmem:[#allocation40_spill] sm:$0xff] %v3907_v2  ;;  %v1361_v27 = vmul.f32 %v3907_v2, %v3907_v2 }
 0x1ff   : > { %v1845_v47 = vadd.f32 1e-05, %v1717_v38  ;;  %1446 = vadd.xlane.f32.xlu1 %v1347_v12  ;;  %1444 = vadd.xlane.f32.xlu0 %v1346_v41  ;;  %v1970_v35 = vmul.f32 %v2969_v52, %v1778_v19  ;;  %4600 = vst [vmem:[#allocation41_spill] sm:$0xff] %v3915_v3  ;;  %v1780_v38 = vsub.f32 %v3450_v58, %v3843_v1 }
 0x200   : > { %v1846_v21 = vadd.f32 1e-05, %v1718_v44  ;;  %v3897_v20 = vpop.xlane.xlu1 %1422 }
 0x201   : > { %v3899_v61 = vpop.xlane.xlu0 %1424  ;;  %2974 = vrsqrt.f32 %v1845_v47  ;;  %v2034_v53 = vmax.f32 %v1970_v35, 0.0  ;;  %v1345_v47 = vmul.f32 %v3919_v42, %v3919_v42 }
 0x202   : > { %2976 = vrsqrt.f32 %v1846_v21  ;;  %v1344_v21 = vmul.f32 %v3915_v3, %v3915_v3 }
 0x203   : > { %1217 = vadd.xlane.f32.xlu1 %v3907_v2  ;;  %1215 = vadd.xlane.f32.xlu0 %v3903_v23 }
 0x204   : > { %v3911_v29 = vpop.xlane.xlu1 %1169 }
 0x205   : > { %v1172_v56 = vpop.xlane.xlu0 %1171 }
 0x206   : > { %v2971_v17 = vpop.eup %2970 }
 0x207   : > { %v2973_v44 = vpop.eup %2972  ;;  %1185 = vadd.xlane.f32.xlu1 %v3919_v42  ;;  %1183 = vadd.xlane.f32.xlu0 %v3915_v3  ;;  %v1971_v52 = vmul.f32 %v2971_v17, %v1779_v48  ;;  %v4602_v48 = vld [vmem:[#allocation8_spill] sm:$0xff]  ;;  %v1519_v3 = vmul.f32 0.0078125, %v3778_v13 }
 0x208   : > { %v3927_v12 = vpop.xlane.xlu1 %1426  ;;  %v1972_v41 = vmul.f32 %v2973_v44, %v1780_v38  ;;  %v1781_v38 = vsub.f32 %v4602_v48, %v3867_v7  ;;  %v4603_v44 = vld [vmem:[#allocation7_spill] sm:$0xff] }
 0x209   : > { %v1429_v10 = vpop.xlane.xlu0 %1428  ;;  %v2035_v32 = vmax.f32 %v1971_v52, 0.0  ;;  %v1782_v35 = vsub.f32 %v4603_v44, %v3869_v0 }
 0x20a   : > { %v2036_v23 = vmax.f32 %v1972_v41, 0.0 }
 0x20b   : > { %1474 = vadd.xlane.f32.xlu1 %v1361_v27  ;;  %1472 = vadd.xlane.f32.xlu0 %v1360_v63  ;;  %v3933_v19 = vpack.c.bf16 %v2035_v32, %v2034_v53  ;;  %v3944_v27 = vmul.f32 0.0078125, %v3762_v22 }
 0x20c   : > { %v1174_v58 = vpop.xlane.xlu1 %1173 }
 0x20d   : > { %v1176_v1 = vpop.xlane.xlu0 %1175  ;;  %v1583_v7 = vmul.f32 %v3944_v27, %v3944_v27 }
 0x20e   : > { %v2975_v17 = vpop.eup %2974  ;;  %v3951_v48 = vmul.f32 0.0078125, %v1176_v1 }
 0x20f   : > { %v2977_v52 = vpop.eup %2976  ;;  %1442 = vadd.xlane.f32.xlu1 %v1345_v47  ;;  %1440 = vadd.xlane.f32.xlu0 %v1344_v21  ;;  %v1973_v42 = vmul.f32 %v2975_v17, %v1781_v38  ;;  %v3959_v17 = vmul.f32 0.0078125, %v1172_v56 }
 0x210   : > { %v1431_v63 = vpop.xlane.xlu1 %1430  ;;  %v3946_v32 = vmul.f32 %v2977_v52, %v1782_v35  ;;  %v1647_v35 = vsub.f32 %v1519_v3, %v1583_v7  ;;  %v1596_v13 = vmul.f32 %v3951_v48, %v3951_v48  ;;  %v1788_v62 = vsub.f32 %v4608_v18, %v3951_v48 }
 0x211   : > { %v1433_v53 = vpop.xlane.xlu0 %1432  ;;  %v2037_v2 = vmax.f32 %v1973_v42, 0.0  ;;  %v1531_v54 = vmul.f32 0.0078125, %v1431_v63  ;;  %v1594_v39 = vmul.f32 %v3959_v17, %v3959_v17  ;;  %v2030_v48 = vmax.f32 %v3837_v46, 0.0 }
 0x212   : > { %v1532_v52 = vmul.f32 0.0078125, %v1433_v53  ;;  %v1530_v53 = vmul.f32 0.0078125, %v1429_v10 }
 0x213   : > { %v3953_v21 = vpack.c.bf16 %v2037_v2, %v2036_v23 }
 0x214   : > { %v1178_v0 = vpop.xlane.xlu1 %1177  ;;  %v1660_v3 = vsub.f32 %v1532_v52, %v1596_v13 }
 0x215   : > { %v1180_v47 = vpop.xlane.xlu0 %1179  ;;  %v3955_v22 = vmul.f32 0.0078125, %v1178_v0  ;;  %v1711_v0 = vmax.f32 %v1647_v35, 0.0  ;;  %v1658_v35 = vsub.f32 %v1530_v53, %v1594_v39 }
 0x216   : > { %v3957_v44 = vmul.f32 0.0078125, %v1180_v47  ;;  %v3967_v47 = vmul.f32 0.0078125, %v1174_v58  ;;  %v1724_v10 = vmax.f32 %v1660_v3, 0.0 }
 0x217   : > { %v1597_v1 = vmul.f32 %v3955_v22, %v3955_v22  ;;  %v1839_v37 = vadd.f32 1e-05, %v1711_v0  ;;  %v1529_v0 = vmul.f32 0.0078125, %v3927_v12 }
 0x218   : > { %v1435_v42 = vpop.xlane.xlu1 %1434  ;;  %v1598_v23 = vmul.f32 %v3957_v44, %v3957_v44  ;;  %v1595_v58 = vmul.f32 %v3967_v47, %v3967_v47  ;;  %v1852_v39 = vadd.f32 1e-05, %v1724_v10 }
 0x219   : > { %v1437_v41 = vpop.xlane.xlu0 %1436  ;;  %v1533_v2 = vmul.f32 0.0078125, %v1435_v42  ;;  %v3974_v42 = vmul.f32 0.0078125, %v3811_v14  ;;  %2978 = vrsqrt.f32 %v1839_v37 }
 0x21a   : > { %v1534_v38 = vmul.f32 0.0078125, %v1437_v41  ;;  %v1659_v41 = vsub.f32 %v1531_v54, %v1595_v58  ;;  %v1528_v58 = vmul.f32 0.0078125, %v3899_v61 }
 0x21b   : > { %v1661_v56 = vsub.f32 %v1533_v2, %v1597_v1  ;;  %v3985_v2 = vmul.f32 0.0078125, %v3833_v4 }
 0x21c   : > { %v1662_v7 = vsub.f32 %v1534_v38, %v1598_v23  ;;  %v1439_v60 = vpop.xlane.xlu1 %1438  ;;  %v3988_v38 = vmul.f32 0.0078125, %v3911_v29  ;;  %v1723_v3 = vmax.f32 %v1659_v41, 0.0 }
 0x21d   : > { %v1182_v34 = vpop.xlane.xlu0 %1181  ;;  %v1725_v8 = vmax.f32 %v1661_v56, 0.0  ;;  %v1535_v63 = vmul.f32 0.0078125, %v1439_v60  ;;  %v1722_v60 = vmax.f32 %v1658_v35, 0.0  ;;  %v1631_v37 = vmul.f32 %v3985_v2, %v3985_v2 }
 0x21e   : > { %v1726_v36 = vmax.f32 %v1662_v7, 0.0  ;;  %v3971_v57 = vmul.f32 0.0078125, %v1182_v34  ;;  %v1593_v10 = vmul.f32 %v3988_v38, %v3988_v38 }
 0x21f   : > { %v1853_v52 = vadd.f32 1e-05, %v1725_v8  ;;  %v1630_v8 = vmul.f32 %v3974_v42, %v3974_v42 }
 0x220   : > { %v1599_v13 = vmul.f32 %v3971_v57, %v3971_v57  ;;  %v1854_v1 = vadd.f32 1e-05, %v1726_v36  ;;  %v3980_v23 = vpop.xlane.xlu1 %1213  ;;  %v3993_v36 = vmul.f32 0.0078125, %v3888_v15  ;;  %v1850_v15 = vadd.f32 1e-05, %v1722_v60 }
 0x221   : > { %v3982_v34 = vpop.xlane.xlu0 %1211  ;;  %2980 = vrsqrt.f32 %v1853_v52 }
 0x222   : > { %v1663_v14 = vsub.f32 %v1535_v63, %v1599_v13  ;;  %2982 = vrsqrt.f32 %v1854_v1  ;;  %v1592_v52 = vmul.f32 %v3993_v36, %v3993_v36  ;;  %v1657_v63 = vsub.f32 %v1529_v0, %v1593_v10 }
 0x223   : > { %2984 = vrsqrt.f32 %v1852_v39  ;;  %v1851_v13 = vadd.f32 1e-05, %v1723_v3  ;;  %v1527_v39 = vmul.f32 0.0078125, %v3897_v20 }
 0x224   : > { %v1727_v54 = vmax.f32 %v1663_v14, 0.0  ;;  %v1503_v4 = vpop.xlane.xlu1 %1502  ;;  %v4008_v14 = vmul.f32 0.0078125, %v3886_v30 }
 0x225   : > { %v1501_v53 = vpop.xlane.xlu0 %1500  ;;  %v1567_v56 = vmul.f32 0.0078125, %v1503_v4  ;;  %v1656_v4 = vsub.f32 %v1528_v58, %v1592_v52 }
 0x226   : > { %v1855_v29 = vadd.f32 1e-05, %v1727_v54  ;;  %v1566_v7 = vmul.f32 0.0078125, %v1501_v53  ;;  %v1721_v53 = vmax.f32 %v1657_v63, 0.0  ;;  %v1591_v3 = vmul.f32 %v4008_v14, %v4008_v14  ;;  %v4605_v63 = vld [vmem:[#allocation16_spill] sm:$0xff] }
 0x227   : > { %v1695_v35 = vsub.f32 %v1567_v56, %v1631_v37  ;;  %v1720_v30 = vmax.f32 %v1656_v4, 0.0 }
 0x228   : > { %2986 = vrsqrt.f32 %v1855_v29  ;;  %v1694_v12 = vsub.f32 %v1566_v7, %v1630_v8  ;;  %v4003_v41 = vpop.xlane.xlu1 %1470  ;;  %v2979_v29 = vpop.eup %2978  ;;  %v1655_v56 = vsub.f32 %v1527_v39, %v1591_v3  ;;  %v1849_v58 = vadd.f32 1e-05, %v1721_v53  ;;  %v4607_v39 = vld [vmem:[#allocation17_spill] sm:$0xff] }
 0x229   : > { %v4005_v1 = vpop.xlane.xlu0 %1468  ;;  %v1759_v61 = vmax.f32 %v1695_v35, 0.0  ;;  %2988 = vrsqrt.f32 %v1850_v15  ;;  %v4604_v35 = vld [vmem:[#allocation2_spill] sm:$0xff]  ;;  %v1848_v52 = vadd.f32 1e-05, %v1720_v30 }
 0x22a   : > { %v1758_v54 = vmax.f32 %v1694_v12, 0.0  ;;  %2990 = vrsqrt.f32 %v1851_v13  ;;  %v1775_v12 = vsub.f32 %v4604_v35, %v3944_v27  ;;  %v1789_v13 = vsub.f32 %v4605_v63, %v3955_v22 }
 0x22b   : > { %v1887_v60 = vadd.f32 1e-05, %v1759_v61  ;;  %v4606_v61 = vld [vmem:[#allocation15_spill] sm:$0xff] }
 0x22c   : > { %v1886_v8 = vadd.f32 1e-05, %v1758_v54  ;;  %v4011_v37 = vpop.xlane.xlu1 %1241  ;;  %v1790_v54 = vsub.f32 %v4606_v61, %v3957_v44  ;;  %v1967_v53 = vmul.f32 %v2979_v29, %v1775_v12 }
 0x22d   : > { %v4013_v0 = vpop.xlane.xlu0 %1239  ;;  %2992 = vrsqrt.f32 %v1887_v60  ;;  %v1719_v60 = vmax.f32 %v1655_v56, 0.0 }
 0x22e   : > { %2994 = vrsqrt.f32 %v1886_v8  ;;  %v2981_v7 = vpop.eup %2980  ;;  %v1791_v8 = vsub.f32 %v4607_v39, %v3971_v57  ;;  %v2031_v61 = vmax.f32 %v1967_v53, 0.0  ;;  %v4609_v39 = vld [vmem:[#allocation5_spill] sm:$0xff]  ;;  %v4047_v53 = vmul.f32 0.0078125, %v3790_v50 }
 0x22f   : > { %v2983_v15 = vpop.eup %2982  ;;  %2996 = vrsqrt.f32 %v1849_v58  ;;  %v1981_v22 = vmul.f32 %v2981_v7, %v1789_v13  ;;  %v1847_v63 = vadd.f32 1e-05, %v1719_v60  ;;  %v4611_v13 = vld [vmem:[#allocation14_spill] sm:$0xff]  ;;  %v1521_v50 = vmul.f32 0.0078125, %v3809_v5 }
 0x230   : > { %v4017_v20 = vpop.xlane.xlu1 %1209  ;;  %v2985_v4 = vpop.eup %2984  ;;  %v1982_v30 = vmul.f32 %v2983_v15, %v1790_v54  ;;  %2998 = vrsqrt.f32 %v1848_v52  ;;  %v1822_v15 = vsub.f32 %v4609_v39, %v3974_v42  ;;  %v4610_v52 = vld [vmem:[#allocation6_spill] sm:$0xff]  ;;  %v1787_v54 = vsub.f32 %v4611_v13, %v3967_v47 }
 0x231   : > { %v4019_v10 = vpop.xlane.xlu0 %1207  ;;  %v1980_v44 = vmul.f32 %v2985_v4, %v1788_v62  ;;  %v2045_v12 = vmax.f32 %v1981_v22, 0.0  ;;  %v1823_v62 = vsub.f32 %v4610_v52, %v3985_v2  ;;  %3000 = vrsqrt.f32 %v1847_v63 }
 0x232   : > { %v2046_v58 = vmax.f32 %v1982_v30, 0.0  ;;  %v2091_v30 = vpack.c.bf16 %v2031_v61, %v2030_v48  ;;  %v2117_v61 = vld [vmem:[%s4514_s4 + $0x8] sm:$0xff]  ;;  %v4074_v52 = vmul.f32 0.0078125, %v3982_v34  ;;  %v4079_v13 = vmul.f32 0.0078125, %v3980_v23  ;;  %v2116_v23 = vld [vmem:[%s4514_s4] sm:$0xff] }
 0x233   : > { %v2044_v60 = vmax.f32 %v1980_v44, 0.0  ;;  %v4056_v44 = vmul.f32 0.0078125, %v3764_v49  ;;  %2127 = vperm.xlu1 %2823, %v2117_v61   ;;  %2122 = vperm.xlu0 %2822, %v2116_v23  }
 0x234   : > { %v4031_v26 = vpop.xlane.xlu1 %1498 }
 0x235   : > { %v2987_v3 = vpop.eup %2986  ;;  %v4033_v27 = vpop.xlane.xlu0 %1496  ;;  %v2098_v2 = vpack.c.bf16 %v2045_v12, %v2044_v60  ;;  %v1585_v12 = vmul.f32 %v4047_v53, %v4047_v53 }
 0x236   : > { %v1983_v35 = vmul.f32 %v2987_v3, %v1791_v8  ;;  %v2989_v25 = vpop.eup %2988  ;;  %v4612_v3 = vld [vmem:[#allocation11_spill] sm:$0xff] }
 0x237   : > { %v2991_v18 = vpop.eup %2990  ;;  %v1786_v46 = vsub.f32 %v4612_v3, %v3959_v17  ;;  %v4614_v3 = vld [vmem:[#allocation9_spill] sm:$0xff] }
 0x238   : > { %v2047_v56 = vmax.f32 %v1983_v35, 0.0  ;;  %v4035_v57 = vpop.xlane.xlu1 %1466  ;;  %v1979_v35 = vmul.f32 %v2991_v18, %v1787_v54 }
 0x239   : > { %v4037_v29 = vpop.xlane.xlu0 %1464  ;;  %v1978_v63 = vmul.f32 %v2989_v25, %v1786_v46  ;;  %v1784_v46 = vsub.f32 %v4614_v3, %v3993_v36  ;;  %v2118_v36 = vld [vmem:[%s4514_s4 + $0x10] sm:$0xff] }
 0x23a   : > { %v2993_v7 = vpop.eup %2992  ;;  %v2099_v4 = vpack.c.bf16 %v2047_v56, %v2046_v58  ;;  %v1520_v58 = vmul.f32 0.0078125, %v3780_v24  ;;  %v2043_v5 = vmax.f32 %v1979_v35, 0.0  ;;  %v4613_v24 = vld [vmem:[#allocation12_spill] sm:$0xff]  ;;  %2132 = vperm.xlu1 %2823, %v2118_v36  }
 0x23b   : > { %v2995_v8 = vpop.eup %2994  ;;  %v2015_v47 = vmul.f32 %v2993_v7, %v1823_v62  ;;  %v1649_v7 = vsub.f32 %v1521_v50, %v1585_v12  ;;  %v1785_v62 = vsub.f32 %v4613_v24, %v3988_v38  ;;  %v2042_v54 = vmax.f32 %v1978_v63, 0.0 }
 0x23c   : > { %2740 = vmatprep.subr.bf16.mxu1 %v2099_v4  ;;  %v4051_v42 = vpop.xlane.xlu1 %1237  ;;  %v2014_v39 = vmul.f32 %v2995_v8, %v1822_v15  ;;  %v2997_v25 = vpop.eup %2996  ;;  %v1584_v15 = vmul.f32 %v4056_v44, %v4056_v44  ;;  %v1550_v8 = vmul.f32 0.0078125, %v4005_v1 }
 0x23d   : > { %v4053_v22 = vpop.xlane.xlu0 %1235  ;;  %2741 = vmatpush3.bf16.xpose.msra.mxu1 %v2091_v30  ;;  %v2079_v17 = vmax.f32 %v2015_v47, 0.0  ;;  %v2999_v4 = vpop.eup %2998  ;;  %v1551_v30 = vmul.f32 0.0078125, %v4003_v41  ;;  %v2097_v35 = vpack.c.bf16 %v2043_v5, %v2042_v54  ;;  %v1713_v38 = vmax.f32 %v1649_v7, 0.0  ;;  %v4615_v7 = vld [vmem:[#allocation10_spill] sm:$0xff] }
 0x23e   : > { %2742 = vmatprep.subr.bf16.mxu1 %v2098_v2  ;;  %v2078_v56 = vmax.f32 %v2014_v39, 0.0  ;;  %v1648_v60 = vsub.f32 %v1520_v58, %v1584_v15  ;;  %v1977_v39 = vmul.f32 %v2997_v25, %v1785_v62  ;;  %v1614_v47 = vmul.f32 %v4074_v52, %v4074_v52 }
 0x23f   : > { %v1615_v41 = vmul.f32 %v4079_v13, %v4079_v13  ;;  %v1976_v1 = vmul.f32 %v2999_v4, %v1784_v46  ;;  %v1841_v25 = vadd.f32 1e-05, %v1713_v38  ;;  %v4111_v15 = vmul.f32 0.0078125, %v4011_v37 }
 0x240   : > { %v4065_v18 = vpop.xlane.xlu1 %1494  ;;  %v4069_v48 = vpack.c.bf16 %v2079_v17, %v2078_v56  ;;  %v1712_v50 = vmax.f32 %v1648_v60, 0.0  ;;  %v1678_v63 = vsub.f32 %v1550_v8, %v1614_v47  ;;  %v2119_v56 = vld [vmem:[%s4514_s4 + $0x18] sm:$0xff]  ;;  %v3001_v17 = vpop.eup %3000  ;;  %v2041_v5 = vmax.f32 %v1977_v39, 0.0  ;;  %v2424_v8 = vld [vmem:[%s4516_s6] sm:$0x7] }
 0x241   : > { %v4067_v49 = vpop.xlane.xlu0 %1492  ;;  %v1679_v61 = vsub.f32 %v1551_v30, %v1615_v41  ;;  %v1783_v24 = vsub.f32 %v4615_v7, %v4008_v14  ;;  %v1564_v62 = vmul.f32 0.0078125, %v4033_v27  ;;  %v2040_v54 = vmax.f32 %v1976_v1, 0.0  ;;  %2137 = vperm.xlu1 %2823, %v2119_v56  }
 0x242   : > { %v1840_v4 = vadd.f32 1e-05, %v1712_v50  ;;  %v1742_v60 = vmax.f32 %v1678_v63, 0.0  ;;  %3002 = vrsqrt.f32 %v1841_v25  ;;  %v1548_v47 = vmul.f32 0.0078125, %v4037_v29 }
 0x243   : > { %v1743_v3 = vmax.f32 %v1679_v61, 0.0  ;;  %v2096_v14 = vpack.c.bf16 %v2041_v5, %v2040_v54  ;;  %v1975_v27 = vmul.f32 %v3001_v17, %v1783_v24  ;;  %v4141_v56 = vmul.f32 0.0078125, %v4017_v20 }
 0x244   : > { %v4085_v2 = vpop.xlane.xlu1 %1233  ;;  %3004 = vrsqrt.f32 %v1840_v4  ;;  %v1870_v23 = vadd.f32 1e-05, %v1742_v60  ;;  %v1549_v7 = vmul.f32 0.0078125, %v4035_v57  ;;  %v4149_v24 = vmul.f32 0.0078125, %v4051_v42 }
 0x245   : > { %v4087_v34 = vpop.xlane.xlu0 %1231  ;;  %2743 = vmatpush3.bf16.xpose.msra.mxu1 %v3835_v43  ;;  %v4104_v43 = vmul.f32 0.0078125, %v4013_v0  ;;  %v1565_v0 = vmul.f32 0.0078125, %v4031_v26  ;;  %v4129_v26 = vmul.f32 0.0078125, %v4019_v10  ;;  %2427 = vperm.xlu1 %2823, %v2424_v8   ;;  %v1871_v36 = vadd.f32 1e-05, %v1743_v3  ;;  %v4616_v3 = vld [vmem:[#allocation4_spill] sm:$0xff] }
 0x246   : > { %2744 = vmatprep.subr.bf16.mxu1 %v2097_v35  ;;  %v1629_v35 = vmul.f32 %v4111_v15, %v4111_v15  ;;  %v2039_v50 = vmax.f32 %v1975_v27, 0.0  ;;  %3006 = vrsqrt.f32 %v1870_v23  ;;  %v1613_v20 = vmul.f32 %v4141_v56, %v4141_v56 }
 0x247   : > { %v1628_v37 = vmul.f32 %v4104_v43, %v4104_v43  ;;  %v1612_v10 = vmul.f32 %v4129_v26, %v4129_v26  ;;  %3008 = vrsqrt.f32 %v1871_v36  ;;  %v1563_v60 = vmul.f32 0.0078125, %v4065_v18 }
 0x248   : > { %v4106_v58 = vpop.xlane.xlu1 %1490  ;;  %v1693_v38 = vsub.f32 %v1565_v0, %v1629_v35  ;;  %v1562_v0 = vmul.f32 0.0078125, %v4067_v49  ;;  %v1677_v8 = vsub.f32 %v1549_v7, %v1613_v20  ;;  %v4170_v49 = vmul.f32 0.0078125, %v4085_v2 }
 0x249   : > { %v4108_v12 = vpop.xlane.xlu0 %1488  ;;  %v1692_v39 = vsub.f32 %v1564_v62, %v1628_v37  ;;  %v1676_v61 = vsub.f32 %v1548_v47, %v1612_v10  ;;  %v4153_v62 = vmul.f32 0.0078125, %v4053_v22  ;;  %v1777_v37 = vsub.f32 %v4616_v3, %v4047_v53  ;;  %v4617_v53 = vld [vmem:[#allocation3_spill] sm:$0xff] }
 0x24a   : > { %v1757_v17 = vmax.f32 %v1693_v38, 0.0  ;;  %v4173_v23 = vmul.f32 0.0078125, %v4087_v34  ;;  %v1776_v36 = vsub.f32 %v4617_v53, %v4056_v44  ;;  %v1561_v10 = vmul.f32 0.0078125, %v4106_v58 }
 0x24b   : > { %v1756_v63 = vmax.f32 %v1692_v39, 0.0  ;;  %v1740_v4 = vmax.f32 %v1676_v61, 0.0  ;;  %v1560_v2 = vmul.f32 0.0078125, %v4108_v12  ;;  %v4618_v12 = vld [vmem:[#allocation18_spill] sm:$0xff] }
 0x24c   : > { %v4122_v46 = vpop.xlane.xlu1 %1229  ;;  %v1885_v54 = vadd.f32 1e-05, %v1757_v17  ;;  %v1624_v44 = vmul.f32 %v4173_v23, %v4173_v23 }
 0x24d   : > { %v4124_v30 = vpop.xlane.xlu0 %1227  ;;  %2745 = vmatpush3.bf16.xpose.msra.mxu1 %v3813_v28  ;;  %v2038_v28 = vmax.f32 %v3946_v32, 0.0  ;;  %v1884_v32 = vadd.f32 1e-05, %v1756_v63  ;;  %v1868_v18 = vadd.f32 1e-05, %v1740_v4  ;;  %v4619_v4 = vld [vmem:[#allocation19_spill] sm:$0xff] }
 0x24e   : > { %2746 = vmatprep.subr.bf16.mxu1 %v2096_v14  ;;  %v1626_v14 = vmul.f32 %v4153_v62, %v4153_v62 }
 0x24f   : > { %v2095_v25 = vpack.c.bf16 %v2039_v50, %v2038_v28  ;;  %v3003_v22 = vpop.eup %3002  ;;  %3010 = vrsqrt.f32 %v1884_v32  ;;  %v1741_v50 = vmax.f32 %v1677_v8, 0.0  ;;  %v1625_v28 = vmul.f32 %v4170_v49, %v4170_v49 }
 0x250   : > { %v4133_v41 = vpop.xlane.xlu1 %1486  ;;  %3012 = vrsqrt.f32 %v1885_v54  ;;  %v1690_v39 = vsub.f32 %v1562_v0, %v1626_v14  ;;  %v1969_v63 = vmul.f32 %v3003_v22, %v1777_v37  ;;  %v1806_v32 = vsub.f32 %v4618_v12, %v4074_v52 }
 0x251   : > { %v4135_v1 = vpop.xlane.xlu0 %1484  ;;  %v3005_v35 = vpop.eup %3004  ;;  %3014 = vrsqrt.f32 %v1868_v18  ;;  %v1689_v20 = vsub.f32 %v1561_v10, %v1625_v28  ;;  %v1688_v0 = vsub.f32 %v1560_v2, %v1624_v44  ;;  %v4198_v8 = vmul.f32 0.0078125, %v4122_v46  ;;  %v4620_v10 = vld [vmem:[#allocation21_spill] sm:$0xff]  ;;  %v4621_v2 = vld [vmem:[#allocation20_spill] sm:$0xff] }
 0x252   : > { %v1968_v17 = vmul.f32 %v3005_v35, %v1776_v36  ;;  %v2033_v54 = vmax.f32 %v1969_v63, 0.0  ;;  %v4201_v14 = vmul.f32 0.0078125, %v4124_v30  ;;  %v1559_v18 = vmul.f32 0.0078125, %v4133_v41 }
 0x253   : > { %v3007_v61 = vpop.eup %3006  ;;  %v1752_v46 = vmax.f32 %v1688_v0, 0.0  ;;  %v1623_v36 = vmul.f32 %v4198_v8, %v4198_v8  ;;  %v1821_v63 = vsub.f32 %v4620_v10, %v4111_v15 }
 0x254   : > { %v4143_v29 = vpop.xlane.xlu1 %1225  ;;  %v2032_v22 = vmax.f32 %v1968_v17, 0.0  ;;  %v1998_v3 = vmul.f32 %v3007_v61, %v1806_v32  ;;  %v1622_v17 = vmul.f32 %v4201_v14, %v4201_v14 }
 0x255   : > { %v4145_v5 = vpop.xlane.xlu0 %1223  ;;  %2747 = vmatpush3.bf16.xpose.msra.mxu1 %v3782_v33  ;;  %v1627_v33 = vmul.f32 %v4149_v24, %v4149_v24  ;;  %v1687_v61 = vsub.f32 %v1559_v18, %v1623_v36  ;;  %v1880_v32 = vadd.f32 1e-05, %v1752_v46 }
 0x256   : > { %2748 = vmatprep.subr.bf16.mxu1 %v2095_v25  ;;  %v1754_v25 = vmax.f32 %v1690_v39, 0.0  ;;  %v1753_v39 = vmax.f32 %v1689_v20, 0.0 }
 0x257   : > { %v1691_v27 = vsub.f32 %v1563_v60, %v1627_v33  ;;  %v1807_v60 = vsub.f32 %v4619_v4, %v4079_v13  ;;  %v2092_v13 = vpack.c.bf16 %v2033_v54, %v2032_v22  ;;  %v4622_v54 = vld [vmem:[#allocation23_spill] sm:$0xff] }
 0x258   : > { %v4159_v57 = vpop.xlane.xlu1 %1193  ;;  %v1882_v37 = vadd.f32 1e-05, %v1754_v25  ;;  %v1805_v4 = vsub.f32 %v4622_v54, %v4141_v56 }
 0x259   : > { %v4161_v42 = vpop.xlane.xlu0 %1191  ;;  %v1755_v34 = vmax.f32 %v1691_v27, 0.0 }
 0x25b   : > { %v1883_v33 = vadd.f32 1e-05, %v1755_v34  ;;  %v1820_v34 = vsub.f32 %v4621_v2, %v4104_v43  ;;  %v4247_v2 = vmul.f32 0.0078125, %v4145_v5 }
 0x25c   : > { %v4175_v38 = vpop.xlane.xlu1 %1197 }
 0x25d   : > { %v4177_v47 = vpop.xlane.xlu0 %1195  ;;  %2749 = vmatpush3.bf16.xpose.msra.mxu1 %v3754_v55  ;;  %v3009_v55 = vpop.eup %3008  ;;  %v4243_v10 = vmul.f32 0.0078125, %v4175_v38 }
 0x25e   : > { %2750 = vmatprep.subr.bf16.mxu1 %v3953_v21  ;;  %v1869_v21 = vadd.f32 1e-05, %v1741_v50  ;;  %v1999_v35 = vmul.f32 %v3009_v55, %v1807_v60  ;;  %v1558_v50 = vmul.f32 0.0078125, %v4135_v1  ;;  %v3011_v41 = vpop.eup %3010  ;;  %v1881_v55 = vadd.f32 1e-05, %v1753_v39  ;;  %v4623_v60 = vld [vmem:[#allocation22_spill] sm:$0xff] }
 0x25f   : > { %v3013_v28 = vpop.eup %3012  ;;  %v4223_v20 = vmul.f32 %v3011_v41, %v1820_v34  ;;  %v1804_v0 = vsub.f32 %v4623_v60, %v4129_v26 }
 0x260   : > { %v4189_v7 = vpop.xlane.xlu1 %1454  ;;  %3016 = vrsqrt.f32 %v1869_v21  ;;  %v2063_v44 = vmax.f32 %v1999_v35, 0.0  ;;  %v1686_v21 = vsub.f32 %v1558_v50, %v1622_v17  ;;  %v4229_v22 = vmul.f32 %v3013_v28, %v1821_v63 }
 0x261   : > { %v4191_v58 = vpop.xlane.xlu0 %1452  ;;  %3018 = vrsqrt.f32 %v1883_v33  ;;  %v1751_v35 = vmax.f32 %v1687_v61, 0.0  ;;  %v2076_v63 = vmax.f32 %v4223_v20, 0.0  ;;  %v1543_v61 = vmul.f32 0.0078125, %v4189_v7 }
 0x262   : > { %3020 = vrsqrt.f32 %v1882_v37  ;;  %v4624_v37 = vld [vmem:[#allocation25_spill] sm:$0xff]  ;;  %v1750_v41 = vmax.f32 %v1686_v21, 0.0  ;;  %v2077_v28 = vmax.f32 %v4229_v22, 0.0  ;;  %v1542_v7 = vmul.f32 0.0078125, %v4191_v58 }
 0x263   : > { %v1819_v18 = vsub.f32 %v4624_v37, %v4149_v24  ;;  %3022 = vrsqrt.f32 %v1881_v55 }
 0x264   : > { %v1202_v52 = vpop.xlane.xlu1 %1201  ;;  %3024 = vrsqrt.f32 %v1880_v32  ;;  %v1620_v32 = vmul.f32 %v4247_v2, %v4247_v2 }
 0x265   : > { %v1200_v27 = vpop.xlane.xlu0 %1199  ;;  %v4204_v53 = vmul.f32 0.0078125, %v1202_v52  ;;  %2751 = vmatpush3.bf16.xpose.msra.mxu1 %v3728_v45  ;;  %v2062_v45 = vmax.f32 %v1998_v3, 0.0  ;;  %v3015_v3 = vpop.eup %3014  ;;  %v4625_v52 = vld [vmem:[#allocation24_spill] sm:$0xff] }
 0x266   : > { %v4210_v30 = vmul.f32 0.0078125, %v1200_v27  ;;  %2752 = vmatprep.subr.bf16.mxu1 %v3933_v19  ;;  %v1818_v27 = vsub.f32 %v4625_v52, %v4153_v62  ;;  %v4250_v17 = vmul.f32 %v3015_v3, %v1804_v0 }
 0x267   : > { %v1609_v19 = vmul.f32 %v4204_v53, %v4204_v53  ;;  %v4240_v56 = vpack.c.bf16 %v2063_v44, %v2062_v45  ;;  %v4253_v45 = vmul.f32 0.0078125, %v4177_v47  ;;  %v1607_v47 = vmul.f32 %v4243_v10, %v4243_v10 }
 0x268   : > { %v1459_v1 = vpop.xlane.xlu1 %1458  ;;  %v1608_v43 = vmul.f32 %v4210_v30, %v4210_v30 }
 0x269   : > { %v1457_v25 = vpop.xlane.xlu0 %1456  ;;  %v1545_v12 = vmul.f32 0.0078125, %v1459_v1  ;;  %v1606_v0 = vmul.f32 %v4253_v45, %v4253_v45 }
 0x26a   : > { %v1544_v15 = vmul.f32 0.0078125, %v1457_v25 }
 0x26b   : > { %v1673_v33 = vsub.f32 %v1545_v12, %v1609_v19  ;;  %v1878_v12 = vadd.f32 1e-05, %v1750_v41 }
 0x26c   : > { %v1672_v39 = vsub.f32 %v1544_v15, %v1608_v43  ;;  %v1206_v46 = vpop.xlane.xlu1 %1205  ;;  %v4261_v15 = vmul.f32 0.0078125, %v4143_v29 }
 0x26d   : > { %v1204_v36 = vpop.xlane.xlu0 %1203  ;;  %v4235_v50 = vmul.f32 0.0078125, %v1206_v46  ;;  %2753 = vmatpush3.bf16.xpose.msra.mxu1 %v3696_v59  ;;  %v1737_v34 = vmax.f32 %v1673_v33, 0.0  ;;  %v1879_v59 = vadd.f32 1e-05, %v1751_v35  ;;  %v3017_v19 = vpop.eup %3016  ;;  %v1671_v33 = vsub.f32 %v1543_v61, %v1607_v47 }
 0x26e   : > { %v4238_v26 = vmul.f32 0.0078125, %v1204_v36  ;;  %2754 = vmatprep.subr.bf16.mxu1 %v2092_v13  ;;  %v1736_v1 = vmax.f32 %v1672_v39, 0.0  ;;  %v3019_v60 = vpop.eup %3018  ;;  %v1817_v47 = vsub.f32 %v3650_v51, %v4170_v49 }
 0x26f   : > { %v1611_v13 = vmul.f32 %v4235_v50, %v4235_v50  ;;  %v1865_v21 = vadd.f32 1e-05, %v1737_v34  ;;  %3026 = vrsqrt.f32 %v1879_v59  ;;  %v3021_v39 = vpop.eup %3020  ;;  %v1621_v34 = vmul.f32 %v4261_v15, %v4261_v15 }
 0x270   : > { %v1463_v38 = vpop.xlane.xlu1 %1462  ;;  %v1610_v5 = vmul.f32 %v4238_v26, %v4238_v26  ;;  %v1864_v3 = vadd.f32 1e-05, %v1736_v1  ;;  %3028 = vrsqrt.f32 %v1878_v12  ;;  %v1997_v59 = vmul.f32 %v3017_v19, %v1805_v4  ;;  %v4286_v4 = vld [vmem:[%s4513_s3 + $0x8] sm:$0xff]   ;;  %v3023_v19 = vpop.eup %3022 }
 0x271   : > { %v1461_v25 = vpop.xlane.xlu0 %1460  ;;  %v1547_v44 = vmul.f32 0.0078125, %v1463_v38  ;;  %v1670_v38 = vsub.f32 %v1542_v7, %v1606_v0  ;;  %3030 = vrsqrt.f32 %v1865_v21  ;;  %v4281_v12 = vmul.f32 0.0078125, %v4161_v42  ;;  %v3025_v42 = vpop.eup %3024 }
 0x272   : > { %v1546_v55 = vmul.f32 0.0078125, %v1461_v25  ;;  %3032 = vrsqrt.f32 %v1864_v3  ;;  %v1815_v3 = vsub.f32 %v3680_v6, %v4198_v8 }
 0x273   : > { %v1675_v43 = vsub.f32 %v1547_v44, %v1611_v13  ;;  %v4275_v13 = vmul.f32 0.0078125, %v4159_v57  ;;  %v2011_v57 = vmul.f32 %v3019_v60, %v1819_v18  ;;  %v1734_v62 = vmax.f32 %v1670_v38, 0.0 }
 0x274   : > { %v1674_v54 = vsub.f32 %v1546_v55, %v1610_v5  ;;  %v1483_v29 = vpop.xlane.xlu1 %1482  ;;  %v2010_v55 = vmul.f32 %v3021_v39, %v1818_v27  ;;  %v4626_v27 = vld [vmem:[#allocation26_spill] sm:$0xff]  ;;  %v2060_v18 = vmax.f32 %v4250_v17, 0.0 }
 0x275   : > { %v1481_v35 = vpop.xlane.xlu0 %1480  ;;  %v1739_v46 = vmax.f32 %v1675_v43, 0.0  ;;  %v1557_v41 = vmul.f32 0.0078125, %v1483_v29  ;;  %2755 = vmatpush3.bf16.xpose.msra.mxu1 %v3668_v16  ;;  %v1816_v7 = vsub.f32 %v4626_v27, %v4173_v23  ;;  %v2114_v43 = vpack.c.bf16 %v2077_v28, %v2076_v63 }
 0x276   : > { %v1738_v36 = vmax.f32 %v1674_v54, 0.0  ;;  %v1556_v58 = vmul.f32 0.0078125, %v1481_v35  ;;  %2760 = vmatprep.subr.bf16.mxu1 %v4069_v48  ;;  %v1735_v48 = vmax.f32 %v1671_v33, 0.0  ;;  %v1605_v24 = vmul.f32 %v4275_v13, %v4275_v13 }
 0x277   : > { %v1867_v61 = vadd.f32 1e-05, %v1739_v46  ;;  %v1685_v5 = vsub.f32 %v1557_v41, %v1621_v34  ;;  %v2061_v54 = vmax.f32 %v1997_v59, 0.0  ;;  %v1604_v23 = vmul.f32 %v4281_v12, %v4281_v12 }
 0x278   : > { %v1866_v1 = vadd.f32 1e-05, %v1738_v36  ;;  %v1684_v25 = vsub.f32 %v1556_v58, %v1620_v32  ;;  %v1451_v44 = vpop.xlane.xlu1 %1450  ;;  %v1863_v60 = vadd.f32 1e-05, %v1735_v48  ;;  %v2074_v20 = vmax.f32 %v2010_v55, 0.0 }
 0x279   : > { %v1449_v16 = vpop.xlane.xlu0 %1448  ;;  %3034 = vrsqrt.f32 %v1867_v61  ;;  %v1541_v52 = vmul.f32 0.0078125, %v1451_v44  ;;  %v1749_v37 = vmax.f32 %v1685_v5, 0.0  ;;  %v2075_v22 = vmax.f32 %v2011_v57, 0.0 }
 0x27a   : > { %3036 = vrsqrt.f32 %v1866_v1  ;;  %v1748_v32 = vmax.f32 %v1684_v25, 0.0  ;;  %v1540_v21 = vmul.f32 0.0078125, %v1449_v16  ;;  %v1862_v63 = vadd.f32 1e-05, %v1734_v62  ;;  %v4627_v25 = vld [vmem:[#allocation34_spill] sm:$0xff] }
 0x27b   : > { %v1669_v28 = vsub.f32 %v1541_v52, %v1605_v24  ;;  %v4307_v0 = vmul.f32 %v3025_v42, %v1816_v7  ;;  %v1814_v29 = vsub.f32 %v3676_v40, %v4201_v14  ;;  %v2106_v46 = vpack.c.bf16 %v2061_v54, %v2060_v18 }
 0x27c   : > { %2757 = vmatmul.mubr.bf16.vlgmr.msra.gmra.mxu1 %v3884_v31  ;;  %v1222_v51 = vpop.xlane.xlu1 %1221  ;;  %v4309_v31 = vmul.f32 %v3023_v19, %v1817_v47  ;;  %v1876_v33 = vadd.f32 1e-05, %v1748_v32  ;;  %v1668_v17 = vsub.f32 %v1540_v21, %v1604_v23  ;;  %v3027_v36 = vpop.eup %3026  ;;  %3038 = vrsqrt.f32 %v1863_v60  ;;  %v4628_v47 = vld [vmem:[#allocation33_spill] sm:$0xff] }
 0x27d   : > { %v1220_v49 = vpop.xlane.xlu0 %1219  ;;  %2761 = vmatpush3.bf16.xpose.msra.mxu1 %v4240_v56  ;;  %2758 = vmatprep.mubr.bf16.mxu1 %v4286_v4  ;;  %v1877_v56 = vadd.f32 1e-05, %v1749_v37  ;;  %v4315_v41 = vmul.f32 0.0078125, %v1222_v51  ;;  %v2113_v34 = vpack.c.bf16 %v2075_v22, %v2074_v20  ;;  %3040 = vrsqrt.f32 %v1862_v63  ;;  %v3029_v8 = vpop.eup %3028 }
 0x27e   : > { %2762 = vmatprep.subr.bf16.mxu1 %v2114_v43  ;;  %v4317_v58 = vmul.f32 0.0078125, %v1220_v49  ;;  %v1733_v38 = vmax.f32 %v1669_v28, 0.0  ;;  %v2072_v59 = vmax.f32 %v4307_v0, 0.0  ;;  %v2073_v6 = vmax.f32 %v4309_v31, 0.0  ;;  %v3031_v1 = vpop.eup %3030 }
 0x27f   : > { %v1801_v40 = vsub.f32 %v3772_v11, %v4204_v53  ;;  %v1800_v14 = vsub.f32 %v3768_v9, %v4210_v30  ;;  %3042 = vrsqrt.f32 %v1876_v33  ;;  %v1732_v61 = vmax.f32 %v1668_v17, 0.0  ;;  %v3033_v57 = vpop.eup %3032 }
 0x280   : > { %v1190_v35 = vpop.xlane.xlu1 %1189  ;;  %v1803_v5 = vsub.f32 %v4627_v25, %v4235_v50  ;;  %3044 = vrsqrt.f32 %v1877_v56  ;;  %v1619_v11 = vmul.f32 %v4315_v41, %v4315_v41  ;;  %v1618_v9 = vmul.f32 %v4317_v58, %v4317_v58  ;;  %v4339_v50 = vld [vmem:[%s4513_s3] sm:$0xff]  }
 0x281   : > { %v1188_v39 = vpop.xlane.xlu0 %1187  ;;  %v4327_v44 = vmul.f32 0.0078125, %v1190_v35  ;;  %v1802_v62 = vsub.f32 %v4628_v47, %v4238_v26  ;;  %v1861_v52 = vadd.f32 1e-05, %v1733_v38  ;;  %v2006_v42 = vmul.f32 %v3029_v8, %v1814_v29 }
 0x282   : > { %v4329_v16 = vmul.f32 0.0078125, %v1188_v39  ;;  %v2007_v27 = vmul.f32 %v3027_v36, %v1815_v3  ;;  %v1860_v32 = vadd.f32 1e-05, %v1732_v61  ;;  %v1992_v23 = vmul.f32 %v3033_v57, %v1800_v14 }
 0x283   : > { %v1603_v37 = vmul.f32 %v4327_v44, %v4327_v44  ;;  %3046 = vrsqrt.f32 %v1861_v52  ;;  %v1993_v0 = vmul.f32 %v3031_v1, %v1801_v40  ;;  %v2112_v36 = vpack.c.bf16 %v2073_v6, %v2072_v59 }
 0x284   : > { %2759 = vmatmul.mubr.bf16.gmra.mxu1 %v4286_v4  ;;  %v1479_v55 = vpop.xlane.xlu1 %1478  ;;  %v1602_v51 = vmul.f32 %v4329_v16, %v4329_v16  ;;  %3048 = vrsqrt.f32 %v1860_v32  ;;  %v2070_v38 = vmax.f32 %v2006_v42, 0.0  ;;  %v2056_v40 = vmax.f32 %v1992_v23, 0.0 }
 0x285   : > { %v1477_v48 = vpop.xlane.xlu0 %1476  ;;  %v1555_v53 = vmul.f32 0.0078125, %v1479_v55  ;;  %2763 = vmatpush3.bf16.xpose.msra.mxu1 %v2106_v46  ;;  %2776 = vmatprep.mubr.bf16.mxu1 %v4339_v50  ;;  %v2057_v61 = vmax.f32 %v1993_v0, 0.0  ;;  %v2071_v1 = vmax.f32 %v2007_v27, 0.0 }
 0x286   : > { %v1554_v30 = vmul.f32 0.0078125, %v1477_v48  ;;  %v3035_v19 = vpop.eup %3034  ;;  %2764 = vmatprep.subr.bf16.mxu1 %v2113_v34  ;;  %v4630_v48 = vld [vmem:[#allocation31_spill] sm:$0xff] }
 0x287   : > { %v3037_v7 = vpop.eup %3036  ;;  %v1683_v21 = vsub.f32 %v1555_v53, %v1619_v11  ;;  %v1995_v24 = vmul.f32 %v3035_v19, %v1803_v5  ;;  %v4629_v5 = vld [vmem:[#allocation32_spill] sm:$0xff]  ;;  %v1798_v57 = vsub.f32 %v4630_v48, %v4253_v45  ;;  %v4631_v53 = vld [vmem:[#allocation27_spill] sm:$0xff] }
 0x288   : > { %v1682_v43 = vsub.f32 %v1554_v30, %v1618_v9  ;;  %v1447_v49 = vpop.xlane.xlu1 %1446  ;;  %v1994_v54 = vmul.f32 %v3037_v7, %v1802_v62  ;;  %v1799_v55 = vsub.f32 %v4629_v5, %v4243_v10  ;;  %v1812_v30 = vsub.f32 %v4631_v53, %v4247_v2  ;;  %v4632_v62 = vld [vmem:[#allocation28_spill] sm:$0xff] }
 0x289   : > { %v1445_v18 = vpop.xlane.xlu0 %1444  ;;  %v1747_v26 = vmax.f32 %v1683_v21, 0.0  ;;  %v1539_v20 = vmul.f32 0.0078125, %v1447_v49  ;;  %v2059_v28 = vmax.f32 %v1995_v24, 0.0  ;;  %v3039_v34 = vpop.eup %3038  ;;  %v1813_v52 = vsub.f32 %v4632_v62, %v4261_v15 }
 0x28a   : > { %v1746_v60 = vmax.f32 %v1682_v43, 0.0  ;;  %v1538_v22 = vmul.f32 0.0078125, %v1445_v18  ;;  %v2058_v63 = vmax.f32 %v1994_v54, 0.0  ;;  %v3041_v8 = vpop.eup %3040  ;;  %v1991_v27 = vmul.f32 %v3039_v34, %v1799_v55  ;;  %v4635_v34 = vld [vmem:[#allocation36_spill] sm:$0xff] }
 0x28b   : > { %v1875_v31 = vadd.f32 1e-05, %v1747_v26  ;;  %v1667_v17 = vsub.f32 %v1539_v20, %v1603_v37  ;;  %v1990_v42 = vmul.f32 %v3041_v8, %v1798_v57  ;;  %v2104_v10 = vpack.c.bf16 %v2057_v61, %v2056_v40  ;;  %v4633_v26 = vld [vmem:[#allocation30_spill] sm:$0xff]  ;;  %v4636_v8 = vld [vmem:[#allocation35_spill] sm:$0xff] }
 0x28c   : > { %v1874_v33 = vadd.f32 1e-05, %v1746_v60  ;;  %v1666_v3 = vsub.f32 %v1538_v22, %v1602_v51  ;;  %v1218_v29 = vpop.xlane.xlu1 %1217  ;;  %v2105_v35 = vpack.c.bf16 %v2059_v28, %v2058_v63  ;;  %v3043_v25 = vpop.eup %3042  ;;  %v2111_v7 = vpack.c.bf16 %v2071_v1, %v2070_v38 }
 0x28d   : > { %v1216_v56 = vpop.xlane.xlu0 %1215  ;;  %3050 = vrsqrt.f32 %v1875_v31  ;;  %v1731_v39 = vmax.f32 %v1667_v17, 0.0  ;;  %v3045_v6 = vpop.eup %3044  ;;  %v4354_v19 = vmul.f32 0.0078125, %v1218_v29  ;;  %v2004_v45 = vmul.f32 %v3043_v25, %v1812_v30 }
 0x28e   : > { %v1730_v46 = vmax.f32 %v1666_v3, 0.0  ;;  %3052 = vrsqrt.f32 %v1874_v33  ;;  %2765 = vmatpush3.bf16.xpose.msra.mxu1 %v2105_v35  ;;  %v4356_v47 = vmul.f32 0.0078125, %v1216_v56  ;;  %v2005_v24 = vmul.f32 %v3045_v6, %v1813_v52 }
 0x28f   : > { %v1859_v14 = vadd.f32 1e-05, %v1731_v39  ;;  %2766 = vmatprep.subr.bf16.mxu1 %v2112_v36  ;;  %v1617_v37 = vmul.f32 %v4354_v19, %v4354_v19  ;;  %v2054_v18 = vmax.f32 %v1990_v42, 0.0  ;;  %v2055_v54 = vmax.f32 %v1991_v27, 0.0 }
 0x290   : > { %v1858_v11 = vadd.f32 1e-05, %v1730_v46  ;;  %v1186_v9 = vpop.xlane.xlu1 %1185  ;;  %v1616_v15 = vmul.f32 %v4356_v47, %v4356_v47  ;;  %v3047_v23 = vpop.eup %3046  ;;  %v1797_v60 = vsub.f32 %v4633_v26, %v4275_v13  ;;  %v2068_v33 = vmax.f32 %v2004_v45, 0.0  ;;  %v4634_v13 = vld [vmem:[#allocation29_spill] sm:$0xff]  ;;  %v4640_v26 = vld [vmem:[#allocation39_spill] sm:$0xff] }
 0x291   : > { %v1184_v59 = vpop.xlane.xlu0 %1183  ;;  %3054 = vrsqrt.f32 %v1859_v14  ;;  %v4360_v32 = vmul.f32 0.0078125, %v1186_v9  ;;  %v2069_v17 = vmax.f32 %v2005_v24, 0.0  ;;  %v3049_v3 = vpop.eup %3048  ;;  %v1796_v36 = vsub.f32 %v4634_v13, %v4281_v12  ;;  %v4638_v45 = vld [vmem:[#allocation37_spill] sm:$0xff] }
 0x292   : > { %3056 = vrsqrt.f32 %v1858_v11  ;;  %v4362_v21 = vmul.f32 0.0078125, %v1184_v59  ;;  %v1811_v38 = vsub.f32 %v4635_v34, %v4315_v41  ;;  %v1810_v14 = vsub.f32 %v4636_v8, %v4317_v58 }
 0x293   : > { %v1601_v63 = vmul.f32 %v4360_v32, %v4360_v32  ;;  %v2103_v40 = vpack.c.bf16 %v2055_v54, %v2054_v18  ;;  %v2110_v48 = vpack.c.bf16 %v2069_v17, %v2068_v33  ;;  %v1988_v57 = vmul.f32 %v3049_v3, %v1796_v36  ;;  %v4639_v18 = vld [vmem:[#allocation40_spill] sm:$0xff]  ;;  %v4642_v33 = vld [vmem:[#allocation41_spill] sm:$0xff] }
 0x294   : > { %v1475_v43 = vpop.xlane.xlu1 %1474  ;;  %v1600_v28 = vmul.f32 %v4362_v21, %v4362_v21  ;;  %v1989_v11 = vmul.f32 %v3047_v23, %v1797_v60  ;;  %v1809_v54 = vsub.f32 %v4639_v18, %v4354_v19  ;;  %v1808_v60 = vsub.f32 %v4640_v26, %v4356_v47 }
 0x295   : > { %v1473_v2 = vpop.xlane.xlu0 %1472  ;;  %v1553_v51 = vmul.f32 0.0078125, %v1475_v43  ;;  %v2052_v30 = vmax.f32 %v1988_v57, 0.0  ;;  %v1794_v43 = vsub.f32 %v4638_v45, %v4329_v16  ;;  %v1792_v17 = vsub.f32 %v4642_v33, %v4362_v21 }
 0x296   : > { %v1552_v49 = vmul.f32 0.0078125, %v1473_v2  ;;  %2767 = vmatpush3.bf16.xpose.msra.mxu1 %v2104_v10  ;;  %v2053_v62 = vmax.f32 %v1989_v11, 0.0  ;;  %v4637_v10 = vld [vmem:[#allocation38_spill] sm:$0xff] }
 0x297   : > { %v1681_v20 = vsub.f32 %v1553_v51, %v1617_v37  ;;  %2768 = vmatprep.subr.bf16.mxu1 %v2111_v7  ;;  %v1795_v7 = vsub.f32 %v4637_v10, %v4327_v44 }
 0x298   : > { %v1680_v22 = vsub.f32 %v1552_v49, %v1616_v15  ;;  %v1443_v0 = vpop.xlane.xlu1 %1442  ;;  %v2102_v2 = vpack.c.bf16 %v2053_v62, %v2052_v30 }
 0x299   : > { %v1441_v31 = vpop.xlane.xlu0 %1440  ;;  %v1745_v29 = vmax.f32 %v1681_v20, 0.0  ;;  %v1537_v35 = vmul.f32 0.0078125, %v1443_v0 }
 0x29a   : > { %v1744_v56 = vmax.f32 %v1680_v22, 0.0  ;;  %v1536_v39 = vmul.f32 0.0078125, %v1441_v31  ;;  %v3051_v46 = vpop.eup %3050 }
 0x29b   : > { %v3053_v61 = vpop.eup %3052  ;;  %v1873_v1 = vadd.f32 1e-05, %v1745_v29  ;;  %v1665_v5 = vsub.f32 %v1537_v35, %v1601_v63  ;;  %v2003_v12 = vmul.f32 %v3051_v46, %v1811_v38  ;;  %v4641_v63 = vld [vmem:[#allocation42_spill] sm:$0xff] }
 0x29c   : > { %v1872_v25 = vadd.f32 1e-05, %v1744_v56  ;;  %v1664_v55 = vsub.f32 %v1536_v39, %v1600_v28  ;;  %v2002_v9 = vmul.f32 %v3053_v61, %v1810_v14  ;;  %v1793_v28 = vsub.f32 %v4641_v63, %v4360_v32 }
 0x29d   : > { %3058 = vrsqrt.f32 %v1873_v1  ;;  %v1729_v59 = vmax.f32 %v1665_v5, 0.0  ;;  %v2067_v27 = vmax.f32 %v2003_v12, 0.0  ;;  %v3085_v32 = vmov 0.0  }
 0x29e   : > { %v1728_v6 = vmax.f32 %v1664_v55, 0.0  ;;  %3060 = vrsqrt.f32 %v1872_v25  ;;  %2769 = vmatpush3.bf16.xpose.msra.mxu1 %v2103_v40  ;;  %v3055_v58 = vpop.eup %3054  ;;  %v2066_v42 = vmax.f32 %v2002_v9, 0.0 }
 0x29f   : > { %v1857_v41 = vadd.f32 1e-05, %v1729_v59  ;;  %2770 = vmatprep.subr.bf16.mxu1 %v2110_v48  ;;  %v3057_v52 = vpop.eup %3056  ;;  %v1987_v37 = vmul.f32 %v3055_v58, %v1795_v7 }
 0x2a0   : > { %v1856_v53 = vadd.f32 1e-05, %v1728_v6  ;;  %v1986_v24 = vmul.f32 %v3057_v52, %v1794_v43  ;;  %v2109_v15 = vpack.c.bf16 %v2067_v27, %v2066_v42 }
 0x2a1   : > { %3062 = vrsqrt.f32 %v1857_v41  ;;  %v2051_v49 = vmax.f32 %v1987_v37, 0.0 }
 0x2a2   : > { %3064 = vrsqrt.f32 %v1856_v53  ;;  %v2050_v51 = vmax.f32 %v1986_v24, 0.0 }
 0x2a4   : > { %v2101_v22 = vpack.c.bf16 %v2051_v49, %v2050_v51 }
 0x2a6   : > { %2771 = vmatpush3.bf16.xpose.msra.mxu1 %v2102_v2 }
 0x2a7   : > { %2772 = vmatprep.subr.bf16.mxu1 %v2109_v15 }
 0x2aa   : > { %v3059_v23 = vpop.eup %3058 }
 0x2ab   : > { %v3061_v44 = vpop.eup %3060  ;;  %v2001_v20 = vmul.f32 %v3059_v23, %v1809_v54 }
 0x2ac   : > { %v2000_v16 = vmul.f32 %v3061_v44, %v1808_v60 }
 0x2ad   : > { %v2065_v0 = vmax.f32 %v2001_v20, 0.0 }
 0x2ae   : > { %v3063_v31 = vpop.eup %3062  ;;  %2773 = vmatpush3.bf16.xpose.msra.mxu1 %v2101_v22  ;;  %v2064_v3 = vmax.f32 %v2000_v16, 0.0  ;;  %v4396_v21 = vpop.permute.xlu1 %2127 }
 0x2af   : > { %v3065_v29 = vpop.eup %3064  ;;  %v1985_v19 = vmul.f32 %v3063_v31, %v1793_v28  ;;  %v4398_v34 = vpop.permute.xlu0 %2122 }
 0x2b0   : > { %v2108_v56 = vpack.c.bf16 %v2065_v0, %v2064_v3  ;;  %v1984_v35 = vmul.f32 %v3065_v29, %v1792_v17 }
 0x2b1   : > { %v2049_v39 = vmax.f32 %v1985_v19, 0.0 }
 0x2b2   : > { %2774 = vmatprep.subr.bf16.mxu1 %v2108_v56  ;;  %v2048_v47 = vmax.f32 %v1984_v35, 0.0 }
 0x2b4   : > { %v2100_v46 = vpack.c.bf16 %v2049_v39, %v2048_v47 }
 0x2b5   : > { %v4400_v8 = vpop.permute.xlu1 %2132 }
 0x2b6   : > { %2775 = vmatpush3.bf16.xpose.msra.mxu1 %v2100_v46 }
 0x2bc   : > { %v4421_v57 = vpop.permute.xlu1 %2137 }
 0x2bd   : > { %2777 = vmatmul.mubr.bf16.vlgmr.msra.gmra.mxu1 %v4339_v50 }
 0x2be   : > { %2778 = vmatprep.mubr.bf16.mxu1 %v4286_v4 }
 0x2c5   : > { %2779 = vmatmul.mubr.bf16.gmra.mxu1 %v4286_v4 }
 0x2c6   : > { %2498 = vmatprep.mubr.f32.mxu1 %v3085_v32 }
 0x33c   : > { %v2186_v13 = vpop.f32.mrf.mxu1 }
 0x33d   : > { %v4409_v4 = vadd.f32 %v2186_v13, %v4398_v34 }
 0x33e   : > { %v2188_v36 = vpop.f32.mrf.mxu1 }
 0x33f   : > { %v4412_v1 = vadd.f32 %v2188_v36, %v4398_v34  ;;  %v2299_v59 = vmul.f32 %v4409_v4, %v4409_v4 }
 0x340   : > { %v2190_v38 = vpop.f32.mrf.mxu1 }
 0x341   : > { %v4403_v14 = vadd.f32 %v2190_v38, %v4396_v21  ;;  %v2300_v12 = vmul.f32 %v4412_v1, %v4412_v1 }
 0x342   : > { %v2192_v50 = vpop.f32.mrf.mxu1 }
 0x343   : > { %v4406_v40 = vadd.f32 %v2192_v50, %v4396_v21  ;;  %v2303_v25 = vmul.f32 %v4403_v14, %v4403_v14  ;;  %v2258_v9 = vadd.f32 %v4403_v14, %v4409_v4 }
 0x344   : > { %v2196_v61 = vpop.f32.mrf.mxu1 }
 0x345   : > { %v4417_v5 = vadd.f32 %v2196_v61, %v4400_v8  ;;  %v2304_v55 = vmul.f32 %v4406_v40, %v4406_v40  ;;  %v2267_v41 = vadd.f32 %v4406_v40, %v4412_v1  ;;  %v2315_v58 = vadd.f32 %v2303_v25, %v2299_v59 }
 0x346   : > { %v2198_v48 = vpop.f32.mrf.mxu1 }
 0x347   : > { %v2307_v11 = vmul.f32 %v4417_v5, %v4417_v5  ;;  %v4430_v6 = vadd.f32 %v2198_v48, %v4400_v8  ;;  %v2259_v52 = vadd.f32 %v2258_v9, %v4417_v5  ;;  %v2324_v27 = vadd.f32 %v2304_v55, %v2300_v12 }
 0x348   : > { %v2200_v53 = vpop.f32.mrf.mxu1 }
 0x349   : > { %v2308_v30 = vmul.f32 %v4430_v6, %v4430_v6  ;;  %v2201_v62 = vadd.f32 %v2200_v53, %v4421_v57  ;;  %v2268_v42 = vadd.f32 %v2267_v41, %v4430_v6  ;;  %v2316_v43 = vadd.f32 %v2315_v58, %v2307_v11 }
 0x34a   : > { %v2202_v10 = vpop.f32.mrf.mxu1 }
 0x34b   : > { %v2260_v7 = vadd.f32 %v2259_v52, %v2201_v62  ;;  %v2311_v45 = vmul.f32 %v2201_v62, %v2201_v62  ;;  %v2203_v2 = vadd.f32 %v2202_v10, %v4421_v57  ;;  %v2325_v24 = vadd.f32 %v2324_v27, %v2308_v30 }
 0x34d   : > { %v2261_v37 = vrot.slane %v2260_v7, 4  ;;  %v2317_v15 = vadd.f32 %v2316_v43, %v2311_v45  ;;  %v2269_v51 = vadd.f32 %v2268_v42, %v2203_v2  ;;  %v2312_v49 = vmul.f32 %v2203_v2, %v2203_v2 }
 0x34f   : > { %v2262_v18 = vadd.f32 %v2261_v37, %v2260_v7  ;;  %v2318_v54 = vrot.slane %v2317_v15, 4  ;;  %v2270_v23 = vrot.slane %v2269_v51, 4  ;;  %v2326_v26 = vadd.f32 %v2325_v24, %v2312_v49 }
 0x351   : > { %v2263_v60 = vrot.slane %v2262_v18, 2  ;;  %v2319_v44 = vadd.f32 %v2318_v54, %v2317_v15  ;;  %v2271_v20 = vadd.f32 %v2270_v23, %v2269_v51  ;;  %v2327_v22 = vrot.slane %v2326_v26, 4 }
 0x353   : > { %v2264_v16 = vadd.f32 %v2263_v60, %v2262_v18  ;;  %v2320_v63 = vrot.slane %v2319_v44, 2  ;;  %v2272_v28 = vrot.slane %v2271_v20, 2  ;;  %v2328_v0 = vadd.f32 %v2327_v22, %v2326_v26 }
 0x355   : > { %v2265_v31 = vrot.slane %v2264_v16, 1  ;;  %v2321_v33 = vadd.f32 %v2320_v63, %v2319_v44  ;;  %v2273_v17 = vadd.f32 %v2272_v28, %v2271_v20  ;;  %v2329_v3 = vrot.slane %v2328_v0, 2 }
 0x357   : > { %v2266_v29 = vadd.f32 %v2265_v31, %v2264_v16  ;;  %v2322_v19 = vrot.slane %v2321_v33, 1  ;;  %v2274_v56 = vrot.slane %v2273_v17, 1  ;;  %v2330_v35 = vadd.f32 %v2329_v3, %v2328_v0 }
 0x359   : > { %v2295_v39 = vmul.f32 0.03125, %v2266_v29  ;;  %v2323_v47 = vadd.f32 %v2322_v19, %v2321_v33  ;;  %v2275_v46 = vadd.f32 %v2274_v56, %v2273_v17  ;;  %v2331_v13 = vrot.slane %v2330_v35, 1 }
 0x35b   : > { %v2351_v36 = vmul.f32 0.03125, %v2323_v47  ;;  %v2355_v38 = vmul.f32 %v2295_v39, %v2295_v39  ;;  %v2296_v50 = vmul.f32 0.03125, %v2275_v46  ;;  %v2332_v61 = vadd.f32 %v2331_v13, %v2330_v35 }
 0x35c   : > { %v2379_v58 = vsub.f32 %v2201_v62, %v2295_v39  ;;  %v2375_v10 = vsub.f32 %v4417_v5, %v2295_v39  ;;  %v2371_v37 = vsub.f32 %v4403_v14, %v2295_v39 }
 0x35d   : > { %v2359_v25 = vsub.f32 %v2351_v36, %v2355_v38  ;;  %v2356_v55 = vmul.f32 %v2296_v50, %v2296_v50  ;;  %v2352_v48 = vmul.f32 0.03125, %v2332_v61  ;;  %v2380_v30 = vsub.f32 %v2203_v2, %v2296_v50 }
 0x35e   : > { %v2376_v52 = vsub.f32 %v4430_v6, %v2296_v50  ;;  %v2372_v43 = vsub.f32 %v4406_v40, %v2296_v50  ;;  %v2368_v49 = vsub.f32 %v4412_v1, %v2296_v50  ;;  %v2367_v2 = vsub.f32 %v4409_v4, %v2295_v39  ;;  %v4451_v1 = vld [vmem:[%s4515_s5] sm:$0x7] }
 0x35f   : > { %v2363_v11 = vmax.f32 %v2359_v25, 0.0  ;;  %v2360_v9 = vsub.f32 %v2352_v48, %v2356_v55 }
 0x361   : > { %v2383_v59 = vadd.f32 1e-05, %v2363_v11  ;;  %v2364_v12 = vmax.f32 %v2360_v9, 0.0 }
 0x363   : > { %3066 = vrsqrt.f32 %v2383_v59  ;;  %v2384_v41 = vadd.f32 1e-05, %v2364_v12 }
 0x365   : > { %3068 = vrsqrt.f32 %v2384_v41 }
 0x370   : > { %v3067_v53 = vpop.eup %3066 }
 0x371   : > { %v2403_v27 = vmul.f32 %v3067_v53, %v2379_v58  ;;  %v2399_v24 = vmul.f32 %v3067_v53, %v2375_v10  ;;  %v2395_v62 = vmul.f32 %v3067_v53, %v2371_v37  ;;  %v2391_v23 = vmul.f32 %v3067_v53, %v2367_v2 }
 0x372   : > { %v3069_v42 = vpop.eup %3068 }
 0x373   : > { %v2404_v7 = vmul.f32 %v3069_v42, %v2380_v30  ;;  %v2400_v45 = vmul.f32 %v3069_v42, %v2376_v52  ;;  %v2396_v51 = vmul.f32 %v3069_v42, %v2372_v43  ;;  %v2419_v18 = vmax.f32 %v2403_v27, 0.0 }
 0x374   : > { %v2392_v54 = vmul.f32 %v3069_v42, %v2368_v49  ;;  %v2415_v5 = vmax.f32 %v2399_v24, 0.0  ;;  %v2411_v40 = vmax.f32 %v2395_v62, 0.0  ;;  %v2407_v44 = vmax.f32 %v2391_v23, 0.0 }
 0x375   : > { %v2420_v15 = vmax.f32 %v2404_v7, 0.0  ;;  %v2416_v6 = vmax.f32 %v2400_v45, 0.0  ;;  %v2412_v26 = vmax.f32 %v2396_v51, 0.0 }
 0x376   : > { %v2408_v14 = vmax.f32 %v2392_v54, 0.0 }
 0x377   : > { %2458 = vmatprep.subr.mxu1 %v2420_v15 }
 0x378   : > { %2459 = vmatpush1.msra.mxu1 %v2419_v18 }
 0x379   : > { %2460 = vmatprep.subr.mxu1 %v2416_v6 }
 0x37a   : > { %2461 = vmatpush1.msra.mxu1 %v2415_v5 }
 0x37b   : > { %2462 = vmatprep.subr.mxu1 %v2412_v26 }
 0x37c   : > { %2463 = vmatpush1.msra.mxu1 %v2411_v40 }
 0x37d   : > { %v2239_v60 = vpop.f32.mrf.mxu1  ;;  %2464 = vmatprep.subr.mxu1 %v2408_v14 }
 0x37e   : > { %2465 = vmatpush1.msra.mxu1 %v2407_v44  ;;  %v4460_v16 = vadd.f32 %v2239_v60, %v4398_v34 }
 0x37f   : > { %v2241_v4 = vpop.f32.mrf.mxu1  ;;  %2735 = vmatmul.mubr.msk.f32.vlgmr.msra.gmra.mxu1 %vm2430_vm0, %v4451_v1 }
 0x380   : > { %2569 = vmatprep.mubr.f32.mxu1 %v3085_v32  ;;  %v4466_v0 = vadd.f32 %v2241_v4, %v4398_v34  ;;  %v2301_v32 = vmul.f32 %v4460_v16, %v4460_v16 }
 0x381   : > { %v2243_v20 = vpop.f32.mrf.mxu1 }
 0x382   : > { %v4457_v22 = vadd.f32 %v2243_v20, %v4396_v21  ;;  %v2302_v56 = vmul.f32 %v4466_v0, %v4466_v0 }
 0x383   : > { %v2245_v63 = vpop.f32.mrf.mxu1 }
 0x384   : > { %v4463_v28 = vadd.f32 %v2245_v63, %v4396_v21  ;;  %v2305_v31 = vmul.f32 %v4457_v22, %v4457_v22  ;;  %v2276_v21 = vadd.f32 %v4457_v22, %v4460_v16 }
 0x385   : > { %v2249_v33 = vpop.f32.mrf.mxu1 }
 0x386   : > { %v4471_v17 = vadd.f32 %v2249_v33, %v4400_v8  ;;  %v2306_v3 = vmul.f32 %v4463_v28, %v4463_v28  ;;  %v2333_v35 = vadd.f32 %v2305_v31, %v2301_v32  ;;  %v2285_v47 = vadd.f32 %v4463_v28, %v4466_v0 }
 0x387   : > { %v2251_v29 = vpop.f32.mrf.mxu1 }
 0x388   : > { %v2309_v34 = vmul.f32 %v4471_v17, %v4471_v17  ;;  %v4482_v19 = vadd.f32 %v2251_v29, %v4400_v8  ;;  %v2277_v46 = vadd.f32 %v2276_v21, %v4471_v17  ;;  %v2342_v38 = vadd.f32 %v2306_v3, %v2302_v56 }
 0x389   : > { %v2253_v39 = vpop.f32.mrf.mxu1 }
 0x38a   : > { %v2310_v13 = vmul.f32 %v4482_v19, %v4482_v19  ;;  %v2254_v36 = vadd.f32 %v2253_v39, %v4421_v57  ;;  %v2334_v50 = vadd.f32 %v2333_v35, %v2309_v34  ;;  %v2286_v8 = vadd.f32 %v2285_v47, %v4482_v19 }
 0x38b   : > { %v2255_v61 = vpop.f32.mrf.mxu1 }
 0x38c   : > { %v2278_v25 = vadd.f32 %v2277_v46, %v2254_v36  ;;  %v2313_v55 = vmul.f32 %v2254_v36, %v2254_v36  ;;  %v2256_v48 = vadd.f32 %v2255_v61, %v4421_v57  ;;  %v2343_v11 = vadd.f32 %v2342_v38, %v2310_v13 }
 0x38e   : > { %v2279_v9 = vrot.slane %v2278_v25, 4  ;;  %v2335_v59 = vadd.f32 %v2334_v50, %v2313_v55  ;;  %v2287_v12 = vadd.f32 %v2286_v8, %v2256_v48  ;;  %v2314_v41 = vmul.f32 %v2256_v48, %v2256_v48 }
 0x390   : > { %v2280_v53 = vadd.f32 %v2279_v9, %v2278_v25  ;;  %v2336_v58 = vrot.slane %v2335_v59, 4  ;;  %v2288_v30 = vrot.slane %v2287_v12, 4  ;;  %v2344_v52 = vadd.f32 %v2343_v11, %v2314_v41 }
 0x392   : > { %v2281_v42 = vrot.slane %v2280_v53, 2  ;;  %v2337_v27 = vadd.f32 %v2336_v58, %v2335_v59  ;;  %v2289_v10 = vadd.f32 %v2288_v30, %v2287_v12  ;;  %v2345_v7 = vrot.slane %v2344_v52, 4 }
 0x394   : > { %v2282_v45 = vadd.f32 %v2281_v42, %v2280_v53  ;;  %v2338_v43 = vrot.slane %v2337_v27, 2  ;;  %v2290_v24 = vrot.slane %v2289_v10, 2  ;;  %v2346_v37 = vadd.f32 %v2345_v7, %v2344_v52 }
 0x396   : > { %v2283_v15 = vrot.slane %v2282_v45, 1  ;;  %v2339_v51 = vadd.f32 %v2338_v43, %v2337_v27  ;;  %v2291_v57 = vadd.f32 %v2290_v24, %v2289_v10  ;;  %v2347_v49 = vrot.slane %v2346_v37, 2 }
 0x398   : > { %v2284_v18 = vadd.f32 %v2283_v15, %v2282_v45  ;;  %v2340_v62 = vrot.slane %v2339_v51, 1  ;;  %v2292_v2 = vrot.slane %v2291_v57, 1  ;;  %v2348_v6 = vadd.f32 %v2347_v49, %v2346_v37 }
 0x39a   : > { %v2297_v54 = vmul.f32 0.03125, %v2284_v18  ;;  %v2341_v5 = vadd.f32 %v2340_v62, %v2339_v51  ;;  %v2293_v23 = vadd.f32 %v2292_v2, %v2291_v57  ;;  %v2349_v26 = vrot.slane %v2348_v6, 1 }
 0x39c   : > { %v2353_v40 = vmul.f32 0.03125, %v2341_v5  ;;  %v2357_v14 = vmul.f32 %v2297_v54, %v2297_v54  ;;  %v2298_v60 = vmul.f32 0.03125, %v2293_v23  ;;  %v2350_v44 = vadd.f32 %v2349_v26, %v2348_v6 }
 0x39d   : > { %v2381_v34 = vsub.f32 %v2254_v36, %v2297_v54  ;;  %v2377_v46 = vsub.f32 %v4471_v17, %v2297_v54  ;;  %v2373_v8 = vsub.f32 %v4457_v22, %v2297_v54 }
 0x39e   : > { %v2361_v4 = vsub.f32 %v2353_v40, %v2357_v14  ;;  %v2358_v20 = vmul.f32 %v2298_v60, %v2298_v60  ;;  %v2354_v63 = vmul.f32 0.03125, %v2350_v44  ;;  %v2382_v56 = vsub.f32 %v2256_v48, %v2298_v60 }
 0x39f   : > { %v2378_v35 = vsub.f32 %v4482_v19, %v2298_v60  ;;  %v2374_v50 = vsub.f32 %v4463_v28, %v2298_v60  ;;  %v2370_v11 = vsub.f32 %v4466_v0, %v2298_v60  ;;  %v2369_v48 = vsub.f32 %v4460_v16, %v2297_v54  ;;  %v2428_v0 = vpop.permute.xlu1 %2427 }
 0x3a0   : > { %v2365_v31 = vmax.f32 %v2361_v4, 0.0  ;;  %v2362_v33 = vsub.f32 %v2354_v63, %v2358_v20 }
 0x3a2   : > { %v2385_v32 = vadd.f32 1e-05, %v2365_v31  ;;  %v2366_v3 = vmax.f32 %v2362_v33, 0.0 }
 0x3a4   : > { %3070 = vrsqrt.f32 %v2385_v32  ;;  %v2386_v29 = vadd.f32 1e-05, %v2366_v3 }
 0x3a6   : > { %3072 = vrsqrt.f32 %v2386_v29 }
 0x3b1   : > { %v3071_v21 = vpop.eup %3070 }
 0x3b2   : > { %v2405_v47 = vmul.f32 %v3071_v21, %v2381_v34  ;;  %v2401_v61 = vmul.f32 %v3071_v21, %v2377_v46  ;;  %v2397_v36 = vmul.f32 %v3071_v21, %v2373_v8  ;;  %v2393_v12 = vmul.f32 %v3071_v21, %v2369_v48 }
 0x3b3   : > { %v3073_v39 = vpop.eup %3072 }
 0x3b4   : > { %v2406_v13 = vmul.f32 %v3073_v39, %v2382_v56  ;;  %v2402_v38 = vmul.f32 %v3073_v39, %v2378_v35  ;;  %v2398_v55 = vmul.f32 %v3073_v39, %v2374_v50  ;;  %v2421_v9 = vmax.f32 %v2405_v47, 0.0 }
 0x3b5   : > { %v2394_v59 = vmul.f32 %v3073_v39, %v2370_v11  ;;  %v2417_v17 = vmax.f32 %v2401_v61, 0.0  ;;  %v2413_v41 = vmax.f32 %v2397_v36, 0.0  ;;  %v2409_v53 = vmax.f32 %v2393_v12, 0.0 }
 0x3b6   : > { %v2422_v25 = vmax.f32 %v2406_v13, 0.0  ;;  %v2418_v19 = vmax.f32 %v2402_v38, 0.0  ;;  %v2414_v28 = vmax.f32 %v2398_v55, 0.0 }
 0x3b7   : > { %v2410_v22 = vmax.f32 %v2394_v59, 0.0 }
 0x3b8   : > { %2529 = vmatprep.subr.mxu1 %v2422_v25 }
 0x3b9   : > { %2530 = vmatpush1.msra.mxu1 %v2421_v9 }
 0x3ba   : > { %2531 = vmatprep.subr.mxu1 %v2418_v19 }
 0x3bb   : > { %2532 = vmatpush1.msra.mxu1 %v2417_v17 }
 0x3bc   : > { %2533 = vmatprep.subr.mxu1 %v2414_v28 }
 0x3bd   : > { %2534 = vmatpush1.msra.mxu1 %v2413_v41 }
 0x3be   : > { %2535 = vmatprep.subr.mxu1 %v2410_v22 }
 0x3bf   : > { %2536 = vmatpush1.msra.mxu1 %v2409_v53 }
 0x3c0   : > { %2736 = vmatmul.mubr.msk.f32.vlgmr.msra.gmra.mxu1 %vm2430_vm0, %v4451_v1 }
 0x43f   : > { %v2500_v16 = vpop.f32.mrf.mxu1 }
 0x440   : > { %v2501_v30 = vadd.f32 %v2500_v16, %v2428_v0 }
 0x441   : > { %v2502_v58 = vpop.f32.mrf.mxu1 }
 0x442   : > { %v2503_v52 = vadd.f32 %v2502_v58, %v2428_v0 }
 0x444   : > { %v2580_v42 = vcombine.low %v2501_v30, %v2503_v52 }
 0x446   : > { %2584 = vst [vmem:[%s308_s26] sm:$0x77] %v2580_v42 }
 0x480   : > { %v2571_v27 = vpop.f32.mrf.mxu1 }
 0x481   : > { %v2572_v7 = vadd.f32 %v2571_v27, %v2428_v0 }
 0x482   : > { %v2573_v10 = vpop.f32.mrf.mxu1 }
 0x483   : > { %v2574_v1 = vadd.f32 %v2573_v10, %v2428_v0 }
 0x485   : > { %v2581_v45 = vcombine.low %v2572_v7, %v2574_v1 }
 0x487   : > { %2585 = vst [vmem:[%s308_s26 + $0x8] sm:$0x77] %v2581_v45 }
 0x488 PF: > { %s17_s24 = sadd.s32 1, %s3082_s24  }
 0x489   : > { %p14_p5 = scmp.ge.s32.totalorder %s17_s24, 6  }
 0x48b   :  { %16 = sbr.rel (!%p14_p5) target bundleno = 1 (0x1), region = 78 }

</bundles_post_ra>
